<compile_context>
chip_gen: v7x
topology: tpu7x:2x2x1
jax: 0.10.0
libtpu: 0.0.40
codegen_flags: <defaults>
</compile_context>

<pallas_src>
import jax
import jax.numpy as jnp
from jax.experimental import pallas as pl
from jax.experimental.pallas import tpu as pltpu


def bottleneck_kernel(xb_ref, xt_ref, xd_ref,
                      w1_ref, b1_ref, w2_ref, b2_ref, w3_ref, b3_ref,
                      o_ref):
    _, TH, W, Cin = xb_ref.shape
    _, _, _, Cout = o_ref.shape
    Cmid = w1_ref.shape[1]
    rows = TH * W
    rows_ext = rows + 2 * W

    b = pl.program_id(1)
    nb = pl.num_programs(1)

    w1 = w1_ref[...]
    bias1 = b1_ref[...]

    # ---- conv1 (1x1, BN scale folded into w1) + bias + ReLU ----------------
    def conv1(x2d):
        h = jnp.dot(x2d.astype(jnp.bfloat16), w1,
                    preferred_element_type=jnp.float32)
        return jnp.maximum(h + bias1, 0.0)

    xb = xb_ref[0]                                      # (TH, W, Cin) f32
    h_mid = conv1(xb.reshape(rows, Cin))                # (rows, Cmid)
    h_top = conv1(xt_ref[0, 0])                         # (W, Cmid)
    h_bot = conv1(xd_ref[0, 0])                         # (W, Cmid)

    # Halo rows outside the image realize the 3x3 conv's zero padding along H
    # (the halo BlockSpecs clamp at the boundary, so zero them here).
    h_top = jnp.where(b > 0, h_top, 0.0)
    h_bot = jnp.where(b < nb - 1, h_bot, 0.0)

    h1 = jnp.concatenate([h_top, h_mid, h_bot], axis=0)  # (rows_ext, Cmid) f32
    h1b = h1.astype(jnp.bfloat16)

    # ---- conv2 (3x3, stride=1, pad=1) -------------------------------------
    # dx taps via XLU roll + boundary-column masks (zero padding along W).
    col = jax.lax.broadcasted_iota(jnp.int32, (rows_ext, 1), 0) % W
    left = jnp.where(col == 0, 0.0,
                     pltpu.roll(h1, 1, 0)).astype(jnp.bfloat16)
    right = jnp.where(col == W - 1, 0.0,
                      pltpu.roll(h1, rows_ext - 1, 0)).astype(jnp.bfloat16)
    big = jnp.concatenate([left, h1b, right], axis=-1)   # (rows_ext, 3*Cmid) bf16

    # dy taps: three accumulating K=3*Cmid matmuls (no patch9 materialization).
    h2 = jnp.dot(big[0:rows], w2_ref[0], preferred_element_type=jnp.float32)
    h2 = h2 + jnp.dot(big[W:W + rows], w2_ref[1],
                      preferred_element_type=jnp.float32)
    h2 = h2 + jnp.dot(big[2 * W:2 * W + rows], w2_ref[2],
                      preferred_element_type=jnp.float32)
    h2 = jnp.maximum(h2 + b2_ref[...], 0.0)              # (rows, Cmid)

    # ---- conv3 (1x1, BN scale folded) + bias -------------------------------
    h3 = jnp.dot(h2.astype(jnp.bfloat16), w3_ref[...],
                 preferred_element_type=jnp.float32)
    h3 = h3 + b3_ref[...]                                 # (rows, Cout)

    # ---- residual add (identity path, downsample=None) + ReLU --------------
    out = jnp.maximum(h3 + xb.reshape(rows, Cout), 0.0)
    o_ref[0] = out.reshape(TH, W, Cout).astype(o_ref.dtype)


def _round_up(x, m):
    return (x + m - 1) // m * m


def _pick_band(H, band_rows):
    band_rows = max(1, min(band_rows, H))
    while H % band_rows != 0:
        band_rows -= 1
    return band_rows


def bottleneck_forward(x_nchw, params, band_rows=16):
    w1, s1, b1, w2, s2, b2, w3, s3, b3 = params
    N, C, H, W = x_nchw.shape
    planes = w1.shape[1]
    Cout = w3.shape[1]
    assert C == Cout, "downsample=None requires in_planes == expansion*planes"
    band_rows = _pick_band(H, band_rows)
    nb = H // band_rows

    Cin_p = _round_up(C, 128)
    Cmid_p = _round_up(planes, 128)
    Cout_p = _round_up(Cout, 128)
    assert Cin_p == Cout_p

    # NCHW -> NHWC, pad channels to a lane-dense multiple of 128.
    # TODO(synk): in a full network keep activations NHWC/128-padded end-to-end
    # and drop these per-call transposes/pads/slices (extra HBM passes).
    x = jnp.transpose(x_nchw, (0, 2, 3, 1))
    x = jnp.pad(x, ((0, 0), (0, 0), (0, 0), (0, Cin_p - C)))

    # Fold the eval-mode BN scales into the weight columns (bias-only epilogue).
    def pad2d(w, r, c):
        return jnp.pad(w, ((0, r - w.shape[0]), (0, c - w.shape[1])))

    w1_p = pad2d(w1 * s1.reshape(1, -1), Cin_p, Cmid_p).astype(jnp.bfloat16)
    w2_f = w2 * s2.reshape(1, 1, 1, -1)
    w2_p = jnp.pad(w2_f, ((0, 0), (0, 0),
                          (0, Cmid_p - planes), (0, Cmid_p - planes)))
    # (ky, kx, cin, cout) -> (ky, kx*cin, cout): matches `big`'s lane order.
    w2_p = w2_p.reshape(3, 3 * Cmid_p, Cmid_p).astype(jnp.bfloat16)
    w3_p = pad2d(w3 * s3.reshape(1, -1), Cmid_p, Cout_p).astype(jnp.bfloat16)

    def padv(v, c):
        return jnp.pad(v, ((0, 0), (0, c - v.shape[1]))).astype(jnp.float32)

    b1_p, b2_p, b3_p = padv(b1, Cmid_p), padv(b2, Cmid_p), padv(b3, Cout_p)

    # Cost estimate for the XLA scheduler.
    flops = 2 * N * H * W * (Cin_p * Cmid_p + 9 * Cmid_p * Cmid_p
                             + Cmid_p * Cout_p)
    bytes_accessed = (N * H * W * Cin_p * 4 + N * H * W * Cout_p * 4
                      + (Cin_p * Cmid_p + 9 * Cmid_p * Cmid_p
                         + Cmid_p * Cout_p) * 2
                      + (2 * Cmid_p + Cout_p) * 4)
    cost = pl.CostEstimate(flops=flops, transcendentals=0,
                           bytes_accessed=bytes_accessed)

    const2d = lambda n, b: (0, 0)
    const3d = lambda n, b: (0, 0, 0)

    out_nhwc = pl.pallas_call(
        bottleneck_kernel,
        out_shape=jax.ShapeDtypeStruct((N, H, W, Cout_p), x.dtype),
        grid_spec=pltpu.PrefetchScalarGridSpec(
            num_scalar_prefetch=0,
            grid=(N, nb),
            in_specs=[
                # band rows
                pl.BlockSpec((1, band_rows, W, Cin_p),
                             lambda n, b: (n, b, 0, 0)),
                # 1-row top halo (clamped at the image boundary)
                pl.BlockSpec((1, 1, W, Cin_p),
                             lambda n, b: (n, jnp.maximum(b * band_rows - 1, 0),
                                           0, 0)),
                # 1-row bottom halo (clamped at the image boundary)
                pl.BlockSpec((1, 1, W, Cin_p),
                             lambda n, b: (n, jnp.minimum((b + 1) * band_rows,
                                                          H - 1), 0, 0)),
                pl.BlockSpec(w1_p.shape, const2d),
                pl.BlockSpec(b1_p.shape, const2d),
                pl.BlockSpec(w2_p.shape, const3d),
                pl.BlockSpec(b2_p.shape, const2d),
                pl.BlockSpec(w3_p.shape, const2d),
                pl.BlockSpec(b3_p.shape, const2d),
            ],
            out_specs=pl.BlockSpec((1, band_rows, W, Cout_p),
                                   lambda n, b: (n, b, 0, 0)),
        ),
        compiler_params=pltpu.CompilerParams(
            dimension_semantics=("parallel", "parallel"),
            vmem_limit_bytes=48 * 1024 * 1024),
        cost_estimate=cost,
    )(x, x, x, w1_p, b1_p, w2_p, b2_p, w3_p, b3_p)

    out = out_nhwc[..., :Cout]
    return jnp.transpose(out, (0, 3, 1, 2))   # NHWC -> NCHW


def reference_forward(x_nchw, params):
    """Pure-JAX reference (lax convs, bf16 operands / f32 accumulation)."""
    w1, s1, b1, w2, s2, b2, w3, s3, b3 = params
    x = jnp.transpose(x_nchw, (0, 2, 3, 1))
    dn = ('NHWC', 'HWIO', 'NHWC')
    bf = jnp.bfloat16

    def aff(h, s, b):
        return h * s.reshape(1, 1, 1, -1) + b.reshape(1, 1, 1, -1)

    h = jax.lax.conv_general_dilated(
        x.astype(bf), w1.reshape(1, 1, *w1.shape).astype(bf), (1, 1), 'VALID',
        dimension_numbers=dn, preferred_element_type=jnp.float32)
    h = jnp.maximum(aff(h, s1, b1), 0.0)
    h = jax.lax.conv_general_dilated(
        h.astype(bf), w2.astype(bf), (1, 1), 'SAME',
        dimension_numbers=dn, preferred_element_type=jnp.float32)
    h = jnp.maximum(aff(h, s2, b2), 0.0)
    h = jax.lax.conv_general_dilated(
        h.astype(bf), w3.reshape(1, 1, *w3.shape).astype(bf), (1, 1), 'VALID',
        dimension_numbers=dn, preferred_element_type=jnp.float32)
    h = aff(h, s3, b3)
    out = jnp.maximum(h + x, 0.0)
    return jnp.transpose(out, (0, 3, 1, 2))


if __name__ == "__main__":
    key = jax.random.PRNGKey(0)
    planes = 4
    in_planes = 4 * planes          # expansion * planes (identity add is valid)
    N, H, W = 2, 16, 16
    keys = jax.random.split(key, 8)

    x = jax.random.normal(keys[0], (N, in_planes, H, W), dtype=jnp.float32)

    def bn_fold(k, c):
        kg, kb, km, kv = jax.random.split(k, 4)
        gamma = 1.0 + 0.1 * jax.random.normal(kg, (c,))
        beta = 0.1 * jax.random.normal(kb, (c,))
        mean = 0.1 * jax.random.normal(km, (c,))
        var = jax.random.uniform(kv, (c,), minval=0.5, maxval=1.5)
        scale = gamma / jnp.sqrt(var + 1e-5)
        bias = beta - mean * scale
        return (scale.reshape(1, c).astype(jnp.float32),
                bias.reshape(1, c).astype(jnp.float32))

    # Conv weights: 1x1 convs as (Cin, Cout) matrices; 3x3 conv in HWIO.
    w1 = (0.1 * jax.random.normal(keys[1], (in_planes, planes))).astype(jnp.float32)
    w2 = (0.1 * jax.random.normal(keys[2], (3, 3, planes, planes))).astype(jnp.float32)
    w3 = (0.1 * jax.random.normal(keys[3], (planes, 4 * planes))).astype(jnp.float32)
    s1, b1 = bn_fold(keys[4], planes)
    s2, b2 = bn_fold(keys[5], planes)
    s3, b3 = bn_fold(keys[6], 4 * planes)
    params = (w1, s1, b1, w2, s2, b2, w3, s3, b3)

    # band_rows=8 on a 16-row image exercises the multi-band halo path.
    out = jax.block_until_ready(bottleneck_forward(x, params, band_rows=8))
    ref = reference_forward(x, params)

    assert out.shape == (N, in_planes, H, W)
    max_err = float(jnp.max(jnp.abs(out - ref)))
    assert jnp.allclose(out, ref, atol=2e-2, rtol=2e-2), \
        f"mismatch vs reference (max abs err {max_err})"
    print("KERNEL_OK")
</pallas_src>

<mosaic_0001>
module attributes {stable_mosaic.version = 11 : i64} {
  func.func @bottleneck_kernel(%arg0: i32, %arg1: i32, %arg2: memref<1x8x16x128xf32, #tpu.memory_space<vmem>>, %arg3: memref<1x1x16x128xf32, #tpu.memory_space<vmem>>, %arg4: memref<1x1x16x128xf32, #tpu.memory_space<vmem>>, %arg5: memref<128x128xbf16, #tpu.memory_space<vmem>>, %arg6: memref<1x128xf32, #tpu.memory_space<vmem>>, %arg7: memref<3x384x128xbf16, #tpu.memory_space<vmem>>, %arg8: memref<1x128xf32, #tpu.memory_space<vmem>>, %arg9: memref<128x128xbf16, #tpu.memory_space<vmem>>, %arg10: memref<1x128xf32, #tpu.memory_space<vmem>>, %arg11: memref<1x8x16x128xf32, #tpu.memory_space<vmem>>) attributes {dimension_semantics = [#tpu.dimension_semantics<parallel>, #tpu.dimension_semantics<parallel>], iteration_bounds = array<i64: 2, 2>, scalar_prefetch = 0 : i64, scratch_operands = 0 : i64, tpu.core_type = #tpu.core_type<tc>, window_params = [{transform_indices = @transform_0, window_bounds = array<i64: 1, 8, 16, 128>}, {transform_indices = @transform_1, window_bounds = array<i64: 1, 1, 16, 128>}, {transform_indices = @transform_2, window_bounds = array<i64: 1, 1, 16, 128>}, {pipeline_mode = #tpu.pipeline_mode<synchronous>, transform_indices = @transform_3, window_bounds = array<i64: 128, 128>}, {pipeline_mode = #tpu.pipeline_mode<synchronous>, transform_indices = @transform_4, window_bounds = array<i64: 1, 128>}, {pipeline_mode = #tpu.pipeline_mode<synchronous>, transform_indices = @transform_5, window_bounds = array<i64: 3, 384, 128>}, {pipeline_mode = #tpu.pipeline_mode<synchronous>, transform_indices = @transform_6, window_bounds = array<i64: 1, 128>}, {pipeline_mode = #tpu.pipeline_mode<synchronous>, transform_indices = @transform_7, window_bounds = array<i64: 128, 128>}, {pipeline_mode = #tpu.pipeline_mode<synchronous>, transform_indices = @transform_8, window_bounds = array<i64: 1, 128>}, {transform_indices = @transform_9, window_bounds = array<i64: 1, 8, 16, 128>}]} {
    %c0 = arith.constant 0 : index
    %c0_0 = arith.constant 0 : index
    %0 = vector.load %arg5[%c0, %c0_0] : memref<128x128xbf16, #tpu.memory_space<vmem>>, vector<128x128xbf16>
    %c0_1 = arith.constant 0 : index
    %c0_2 = arith.constant 0 : index
    %1 = vector.load %arg6[%c0_1, %c0_2] : memref<1x128xf32, #tpu.memory_space<vmem>>, vector<1x128xf32>
    %c0_3 = arith.constant 0 : index
    %c0_4 = arith.constant 0 : index
    %c0_5 = arith.constant 0 : index
    %c0_6 = arith.constant 0 : index
    %2 = vector.load %arg2[%c0_3, %c0_4, %c0_5, %c0_6] : memref<1x8x16x128xf32, #tpu.memory_space<vmem>>, vector<1x8x16x128xf32>
    %3 = vector.shape_cast %2 : vector<1x8x16x128xf32> to vector<8x16x128xf32>
    %4 = vector.shape_cast %3 : vector<8x16x128xf32> to vector<128x128xf32>
    %5 = arith.truncf %4 : vector<128x128xf32> to vector<128x128xbf16>
    %cst = arith.constant dense<0.000000e+00> : vector<128x128xf32>
    %6 = tpu.matmul %5, %0, %cst {dimension_numbers = #tpu.dot_dimension_numbers<[1], [0], [0], [1], [0, 0, 1, 1], [], []>} : vector<128x128xbf16>, vector<128x128xbf16>, vector<128x128xf32> -> vector<128x128xf32>
    %7 = vector.broadcast %1 : vector<1x128xf32> to vector<128x128xf32>
    %8 = arith.addf %6, %7 : vector<128x128xf32>
    %cst_7 = arith.constant 0.000000e+00 : f32
    %9 = vector.broadcast %cst_7 : f32 to vector<128x128xf32>
    %10 = arith.maximumf %8, %9 : vector<128x128xf32>
    %c0_8 = arith.constant 0 : index
    %c0_9 = arith.constant 0 : index
    %c0_10 = arith.constant 0 : index
    %c0_11 = arith.constant 0 : index
    %11 = vector.load %arg3[%c0_8, %c0_9, %c0_10, %c0_11] : memref<1x1x16x128xf32, #tpu.memory_space<vmem>>, vector<1x1x16x128xf32>
    %12 = vector.shape_cast %11 : vector<1x1x16x128xf32> to vector<16x128xf32>
    %13 = arith.truncf %12 : vector<16x128xf32> to vector<16x128xbf16>
    %cst_12 = arith.constant dense<0.000000e+00> : vector<16x128xf32>
    %14 = tpu.matmul %13, %0, %cst_12 {dimension_numbers = #tpu.dot_dimension_numbers<[1], [0], [0], [1], [0, 0, 1, 1], [], []>} : vector<16x128xbf16>, vector<128x128xbf16>, vector<16x128xf32> -> vector<16x128xf32>
    %15 = vector.broadcast %1 : vector<1x128xf32> to vector<16x128xf32>
    %16 = arith.addf %14, %15 : vector<16x128xf32>
    %cst_13 = arith.constant 0.000000e+00 : f32
    %17 = vector.broadcast %cst_13 : f32 to vector<16x128xf32>
    %18 = arith.maximumf %16, %17 : vector<16x128xf32>
    %c0_14 = arith.constant 0 : index
    %c0_15 = arith.constant 0 : index
    %c0_16 = arith.constant 0 : index
    %c0_17 = arith.constant 0 : index
    %19 = vector.load %arg4[%c0_14, %c0_15, %c0_16, %c0_17] : memref<1x1x16x128xf32, #tpu.memory_space<vmem>>, vector<1x1x16x128xf32>
    %20 = vector.shape_cast %19 : vector<1x1x16x128xf32> to vector<16x128xf32>
    %21 = arith.truncf %20 : vector<16x128xf32> to vector<16x128xbf16>
    %cst_18 = arith.constant dense<0.000000e+00> : vector<16x128xf32>
    %22 = tpu.matmul %21, %0, %cst_18 {dimension_numbers = #tpu.dot_dimension_numbers<[1], [0], [0], [1], [0, 0, 1, 1], [], []>} : vector<16x128xbf16>, vector<128x128xbf16>, vector<16x128xf32> -> vector<16x128xf32>
    %23 = vector.broadcast %1 : vector<1x128xf32> to vector<16x128xf32>
    %24 = arith.addf %22, %23 : vector<16x128xf32>
    %cst_19 = arith.constant 0.000000e+00 : f32
    %25 = vector.broadcast %cst_19 : f32 to vector<16x128xf32>
    %26 = arith.maximumf %24, %25 : vector<16x128xf32>
    %c0_i32 = arith.constant 0 : i32
    %27 = arith.cmpi sgt, %arg1, %c0_i32 : i32
    %cst_20 = arith.constant 0.000000e+00 : f32
    %28 = vector.broadcast %cst_20 : f32 to vector<16x128xf32>
    %29 = arith.select %27, %18, %28 : vector<16x128xf32>
    %c1_i32 = arith.constant 1 : i32
    %30 = arith.cmpi slt, %arg1, %c1_i32 : i32
    %cst_21 = arith.constant 0.000000e+00 : f32
    %31 = vector.broadcast %cst_21 : f32 to vector<16x128xf32>
    %32 = arith.select %30, %26, %31 : vector<16x128xf32>
    %33 = tpu.concatenate %29, %10, %32 in 0 : vector<16x128xf32>, vector<128x128xf32>, vector<16x128xf32> -> vector<160x128xf32>
    %34 = arith.truncf %33 : vector<160x128xf32> to vector<160x128xbf16>
    %35 = tpu.iota {dimensions = array<i32: 0>} : vector<160x1xi32>
    %c16_i32 = arith.constant 16 : i32
    %c0_i32_22 = arith.constant 0 : i32
    %36 = arith.cmpi eq, %c16_i32, %c0_i32_22 : i32
    %c1_i32_23 = arith.constant 1 : i32
    %37 = arith.select %36, %c1_i32_23, %c16_i32 : i32
    %38 = vector.broadcast %37 : i32 to vector<160x1xi32>
    %39 = arith.remsi %35, %38 : vector<160x1xi32>
    %c0_i32_24 = arith.constant 0 : i32
    %40 = vector.broadcast %c0_i32_24 : i32 to vector<160x1xi32>
    %41 = arith.cmpi ne, %39, %40 : vector<160x1xi32>
    %c0_i32_25 = arith.constant 0 : i32
    %42 = vector.broadcast %c0_i32_25 : i32 to vector<160x1xi32>
    %43 = arith.cmpi slt, %39, %42 : vector<160x1xi32>
    %c0_i32_26 = arith.constant 0 : i32
    %44 = arith.cmpi slt, %37, %c0_i32_26 : i32
    %45 = vector.broadcast %44 : i1 to vector<160x1xi1>
    %46 = vector.broadcast %45 : vector<160x1xi1> to vector<160x1xi1>
    %47 = arith.xori %43, %46 : vector<160x1xi1>
    %48 = arith.andi %47, %41 : vector<160x1xi1>
    %49 = vector.broadcast %37 : i32 to vector<160x1xi32>
    %50 = arith.addi %39, %49 : vector<160x1xi32>
    %51 = arith.select %48, %50, %39 : vector<160x1xi1>, vector<160x1xi32>
    %c0_i32_27 = arith.constant 0 : i32
    %52 = vector.broadcast %c0_i32_27 : i32 to vector<160x1xi32>
    %53 = arith.cmpi eq, %51, %52 : vector<160x1xi32>
    %c1_i32_28 = arith.constant 1 : i32
    %54 = tpu.dynamic_rotate %33 by %c1_i32_28 dim 0 : vector<160x128xf32>, i32 -> vector<160x128xf32>
    %cst_29 = arith.constant 0.000000e+00 : f32
    %55 = vector.shape_cast %53 : vector<160x1xi1> to vector<160x1xi1>
    %56 = vector.broadcast %55 : vector<160x1xi1> to vector<160x128xi1>
    %57 = vector.broadcast %cst_29 : f32 to vector<160x128xf32>
    %58 = arith.select %56, %57, %54 : vector<160x128xi1>, vector<160x128xf32>
    %59 = arith.truncf %58 : vector<160x128xf32> to vector<160x128xbf16>
    %c15_i32 = arith.constant 15 : i32
    %60 = vector.broadcast %c15_i32 : i32 to vector<160x1xi32>
    %61 = arith.cmpi eq, %51, %60 : vector<160x1xi32>
    %c159_i32 = arith.constant 159 : i32
    %62 = tpu.dynamic_rotate %33 by %c159_i32 dim 0 : vector<160x128xf32>, i32 -> vector<160x128xf32>
    %cst_30 = arith.constant 0.000000e+00 : f32
    %63 = vector.shape_cast %61 : vector<160x1xi1> to vector<160x1xi1>
    %64 = vector.broadcast %63 : vector<160x1xi1> to vector<160x128xi1>
    %65 = vector.broadcast %cst_30 : f32 to vector<160x128xf32>
    %66 = arith.select %64, %65, %62 : vector<160x128xi1>, vector<160x128xf32>
    %67 = arith.truncf %66 : vector<160x128xf32> to vector<160x128xbf16>
    %68 = tpu.concatenate %59, %34, %67 in 1 : vector<160x128xbf16>, vector<160x128xbf16>, vector<160x128xbf16> -> vector<160x384xbf16>
    %69 = vector.extract_strided_slice %68 {offsets = [0, 0], sizes = [128, 384], strides = [1, 1]} : vector<160x384xbf16> to vector<128x384xbf16>
    %c0_31 = arith.constant 0 : index
    %c0_32 = arith.constant 0 : index
    %c0_33 = arith.constant 0 : index
    %70 = vector.load %arg7[%c0_31, %c0_32, %c0_33] : memref<3x384x128xbf16, #tpu.memory_space<vmem>>, vector<1x384x128xbf16>
    %71 = vector.shape_cast %70 : vector<1x384x128xbf16> to vector<384x128xbf16>
    %cst_34 = arith.constant dense<0.000000e+00> : vector<128x128xf32>
    %72 = tpu.matmul %69, %71, %cst_34 {dimension_numbers = #tpu.dot_dimension_numbers<[1], [0], [0], [1], [0, 0, 1, 1], [], []>} : vector<128x384xbf16>, vector<384x128xbf16>, vector<128x128xf32> -> vector<128x128xf32>
    %73 = vector.extract_strided_slice %68 {offsets = [16, 0], sizes = [128, 384], strides = [1, 1]} : vector<160x384xbf16> to vector<128x384xbf16>
    %c1 = arith.constant 1 : index
    %c0_35 = arith.constant 0 : index
    %c0_36 = arith.constant 0 : index
    %74 = vector.load %arg7[%c1, %c0_35, %c0_36] : memref<3x384x128xbf16, #tpu.memory_space<vmem>>, vector<1x384x128xbf16>
    %75 = vector.shape_cast %74 : vector<1x384x128xbf16> to vector<384x128xbf16>
    %cst_37 = arith.constant dense<0.000000e+00> : vector<128x128xf32>
    %76 = tpu.matmul %73, %75, %cst_37 {dimension_numbers = #tpu.dot_dimension_numbers<[1], [0], [0], [1], [0, 0, 1, 1], [], []>} : vector<128x384xbf16>, vector<384x128xbf16>, vector<128x128xf32> -> vector<128x128xf32>
    %77 = arith.addf %72, %76 : vector<128x128xf32>
    %78 = vector.extract_strided_slice %68 {offsets = [32, 0], sizes = [128, 384], strides = [1, 1]} : vector<160x384xbf16> to vector<128x384xbf16>
    %c2 = arith.constant 2 : index
    %c0_38 = arith.constant 0 : index
    %c0_39 = arith.constant 0 : index
    %79 = vector.load %arg7[%c2, %c0_38, %c0_39] : memref<3x384x128xbf16, #tpu.memory_space<vmem>>, vector<1x384x128xbf16>
    %80 = vector.shape_cast %79 : vector<1x384x128xbf16> to vector<384x128xbf16>
    %cst_40 = arith.constant dense<0.000000e+00> : vector<128x128xf32>
    %81 = tpu.matmul %78, %80, %cst_40 {dimension_numbers = #tpu.dot_dimension_numbers<[1], [0], [0], [1], [0, 0, 1, 1], [], []>} : vector<128x384xbf16>, vector<384x128xbf16>, vector<128x128xf32> -> vector<128x128xf32>
    %82 = arith.addf %77, %81 : vector<128x128xf32>
    %c0_41 = arith.constant 0 : index
    %c0_42 = arith.constant 0 : index
    %83 = vector.load %arg8[%c0_41, %c0_42] : memref<1x128xf32, #tpu.memory_space<vmem>>, vector<1x128xf32>
    %84 = vector.broadcast %83 : vector<1x128xf32> to vector<128x128xf32>
    %85 = arith.addf %82, %84 : vector<128x128xf32>
    %cst_43 = arith.constant 0.000000e+00 : f32
    %86 = vector.broadcast %cst_43 : f32 to vector<128x128xf32>
    %87 = arith.maximumf %85, %86 : vector<128x128xf32>
    %88 = arith.truncf %87 : vector<128x128xf32> to vector<128x128xbf16>
    %c0_44 = arith.constant 0 : index
    %c0_45 = arith.constant 0 : index
    %89 = vector.load %arg9[%c0_44, %c0_45] : memref<128x128xbf16, #tpu.memory_space<vmem>>, vector<128x128xbf16>
    %cst_46 = arith.constant dense<0.000000e+00> : vector<128x128xf32>
    %90 = tpu.matmul %88, %89, %cst_46 {dimension_numbers = #tpu.dot_dimension_numbers<[1], [0], [0], [1], [0, 0, 1, 1], [], []>} : vector<128x128xbf16>, vector<128x128xbf16>, vector<128x128xf32> -> vector<128x128xf32>
    %c0_47 = arith.constant 0 : index
    %c0_48 = arith.constant 0 : index
    %91 = vector.load %arg10[%c0_47, %c0_48] : memref<1x128xf32, #tpu.memory_space<vmem>>, vector<1x128xf32>
    %92 = vector.broadcast %91 : vector<1x128xf32> to vector<128x128xf32>
    %93 = arith.addf %90, %92 : vector<128x128xf32>
    %94 = vector.shape_cast %3 : vector<8x16x128xf32> to vector<128x128xf32>
    %95 = arith.addf %93, %94 : vector<128x128xf32>
    %cst_49 = arith.constant 0.000000e+00 : f32
    %96 = vector.broadcast %cst_49 : f32 to vector<128x128xf32>
    %97 = arith.maximumf %95, %96 : vector<128x128xf32>
    %98 = vector.shape_cast %97 : vector<128x128xf32> to vector<8x16x128xf32>
    %c0_50 = arith.constant 0 : index
    %c0_51 = arith.constant 0 : index
    %c0_52 = arith.constant 0 : index
    %c0_53 = arith.constant 0 : index
    %99 = vector.load %arg11[%c0_50, %c0_51, %c0_52, %c0_53] : memref<1x8x16x128xf32, #tpu.memory_space<vmem>>, vector<1x8x16x128xf32>
    %100 = vector.shape_cast %99 : vector<1x8x16x128xf32> to vector<8x16x128xf32>
    %101 = vector.shape_cast %98 : vector<8x16x128xf32> to vector<1x8x16x128xf32>
    tpu.vector_store %arg11[%c0_50, %c0_51, %c0_52, %c0_53], %101 {strides = array<i32>} : memref<1x8x16x128xf32, #tpu.memory_space<vmem>>, vector<1x8x16x128xf32>,
    return
  }
  func.func @transform_0(%arg0: i32, %arg1: i32) -> (i32, i32, i32, i32) {
    %c0_i32 = arith.constant 0 : i32
    %c0_i32_0 = arith.constant 0 : i32
    %c0_i32_1 = arith.constant 0 : i32
    return %arg0, %arg1, %c0_i32, %c0_i32_0 : i32, i32, i32, i32
  }
  func.func @transform_1(%arg0: i32, %arg1: i32) -> (i32, i32, i32, i32) {
    %c8_i32 = arith.constant 8 : i32
    %0 = arith.muli %arg1, %c8_i32 : i32
    %c1_i32 = arith.constant 1 : i32
    %1 = arith.subi %0, %c1_i32 : i32
    %c0_i32 = arith.constant 0 : i32
    %2 = arith.maxsi %1, %c0_i32 : i32
    %c0_i32_0 = arith.constant 0 : i32
    %c0_i32_1 = arith.constant 0 : i32
    %c0_i32_2 = arith.constant 0 : i32
    return %arg0, %2, %c0_i32_0, %c0_i32_1 : i32, i32, i32, i32
  }
  func.func @transform_2(%arg0: i32, %arg1: i32) -> (i32, i32, i32, i32) {
    %c1_i32 = arith.constant 1 : i32
    %0 = arith.addi %arg1, %c1_i32 : i32
    %c8_i32 = arith.constant 8 : i32
    %1 = arith.muli %0, %c8_i32 : i32
    %c15_i32 = arith.constant 15 : i32
    %2 = arith.minsi %1, %c15_i32 : i32
    %c0_i32 = arith.constant 0 : i32
    %c0_i32_0 = arith.constant 0 : i32
    %c0_i32_1 = arith.constant 0 : i32
    return %arg0, %2, %c0_i32, %c0_i32_0 : i32, i32, i32, i32
  }
  func.func @transform_3(%arg0: i32, %arg1: i32) -> (i32, i32) {
    %c0_i32 = arith.constant 0 : i32
    %c0_i32_0 = arith.constant 0 : i32
    %c0_i32_1 = arith.constant 0 : i32
    return %c0_i32, %c0_i32_0 : i32, i32
  }
  func.func @transform_4(%arg0: i32, %arg1: i32) -> (i32, i32) {
    %c0_i32 = arith.constant 0 : i32
    %c0_i32_0 = arith.constant 0 : i32
    %c0_i32_1 = arith.constant 0 : i32
    return %c0_i32, %c0_i32_0 : i32, i32
  }
  func.func @transform_5(%arg0: i32, %arg1: i32) -> (i32, i32, i32) {
    %c0_i32 = arith.constant 0 : i32
    %c0_i32_0 = arith.constant 0 : i32
    %c0_i32_1 = arith.constant 0 : i32
    %c0_i32_2 = arith.constant 0 : i32
    return %c0_i32, %c0_i32_0, %c0_i32_1 : i32, i32, i32
  }
  func.func @transform_6(%arg0: i32, %arg1: i32) -> (i32, i32) {
    %c0_i32 = arith.constant 0 : i32
    %c0_i32_0 = arith.constant 0 : i32
    %c0_i32_1 = arith.constant 0 : i32
    return %c0_i32, %c0_i32_0 : i32, i32
  }
  func.func @transform_7(%arg0: i32, %arg1: i32) -> (i32, i32) {
    %c0_i32 = arith.constant 0 : i32
    %c0_i32_0 = arith.constant 0 : i32
    %c0_i32_1 = arith.constant 0 : i32
    return %c0_i32, %c0_i32_0 : i32, i32
  }
  func.func @transform_8(%arg0: i32, %arg1: i32) -> (i32, i32) {
    %c0_i32 = arith.constant 0 : i32
    %c0_i32_0 = arith.constant 0 : i32
    %c0_i32_1 = arith.constant 0 : i32
    return %c0_i32, %c0_i32_0 : i32, i32
  }
  func.func @transform_9(%arg0: i32, %arg1: i32) -> (i32, i32, i32, i32) {
    %c0_i32 = arith.constant 0 : i32
    %c0_i32_0 = arith.constant 0 : i32
    %c0_i32_1 = arith.constant 0 : i32
    return %arg0, %arg1, %c0_i32, %c0_i32_0 : i32, i32, i32, i32
  }
}

</mosaic_0001>

<bundles_post_ra>
// kernel: tpu_custom_call.1
= control target key start
LH: loop header
LB: loop body
LE: loop exit
PB: predicated region body
PF: predicated region fallthrough
CT: control target
= control target key end

     0   :  { %s6099_s0 = inlined_call_operand.hbm [shape: f32[2,16,16,128], index: 0, kind: input, shape index: {}]   ;;  %s6100_s1 = inlined_call_operand.hbm [shape: f32[2,16,16,128], index: 1, kind: input, shape index: {}]   ;;  %s6101_s2 = inlined_call_operand.hbm [shape: f32[2,16,16,128], index: 2, kind: input, shape index: {}]   ;;  %s6102_s3 = inlined_call_operand.hbm [shape: bf16[128,128], index: 3, kind: input, shape index: {}]   ;;  %s6103_s4 = inlined_call_operand.vmem [shape: f32[1,128], index: 4, kind: input, shape index: {}]   ;;  %s6104_s5 = inlined_call_operand.hbm [shape: bf16[3,384,128], index: 5, kind: input, shape index: {}]   ;;  %s6105_s6 = inlined_call_operand.vmem [shape: f32[1,128], index: 6, kind: input, shape index: {}]   ;;  %s6106_s7 = inlined_call_operand.hbm [shape: bf16[128,128], index: 7, kind: input, shape index: {}]   ;;  %s6107_s8 = inlined_call_operand.vmem [shape: f32[1,128], index: 8, kind: input, shape index: {}]   ;;  %s6108_s9 = inlined_call_operand.hbm [shape: f32[2,16,16,128], index: 9, kind: output, shape index: {}]  }
   0x1   :  { %6164 = sst [smem:[#allocation39_spill]] %s6099_s0 }
   0x2   :  { %6165 = sst [smem:[#allocation40_spill]] %s6100_s1 }
   0x3   :  { %6166 = sst [smem:[#allocation41_spill]] %s6101_s2 }
   0x4   :  { %6167 = sst [smem:[#allocation42_spill]] %s6102_s3 }
   0x5   :  { %6168 = sst [smem:[#allocation43_spill]] %s6103_s4 }
   0x6   :  { %6169 = sst [smem:[#allocation44_spill]] %s6104_s5 }
   0x7   :  { %6170 = sst [smem:[#allocation45_spill]] %s6105_s6 }
   0x8   :  { %6171 = sst [smem:[#allocation46_spill]] %s6106_s7 }
   0x9   :  { %6172 = sst [smem:[#allocation47_spill]] %s6107_s8 }
   0xa   :  { %6173 = sst [smem:[#allocation48_spill]] %s6108_s9 }
   0xb   :  { %14 = vsyncpa [#allocation3], 0 }
   0xc   :  { %16 = vsyncpa [#allocation3 + $0x1], 0 }
   0xd   :  { %17 = vsyncpa [#allocation6], 0 }
   0xe   :  { %19 = vsyncpa [#allocation6 + $0x1], 0 }
   0xf   :  { %20 = vsyncpa [#allocation9], 0 }
  0x10   :  { %21 = vsyncpa [#allocation12], 0 }
  0x11   :  { %22 = vsyncpa [#allocation4], 0 }
  0x12   :  { %24 = vsyncpa [#allocation4 + $0x1], 0  ;;  %s4618_s30 = smov 0   ;;  %s4620_s10 = smov 0  }
  0x13   :  { %s4622_s11 = smov 0   ;;  %s4624_s12 = smov 0  }
  0x14   :  { %s4626_s13 = smov 0   ;;  %s4628_s14 = smov 0  }
  0x15   :  { %s4630_s15 = smov 0   ;;  %s4632_s16 = smov 0  }
  0x16   :  { %s4634_s17 = smov 0   ;;  %s4636_s18 = smov 0  }
  0x17   :  { %s4638_s19 = smov 0   ;;  %s4640_s20 = smov 0  }
  0x18   :  { %s4642_s21 = smov 0   ;;  %s4644_s22 = smov 0  }
  0x19 LB: > { %6174 = sst [smem:[#allocation20_spill]] %s4498_s30  ;;  %s4689_s23 = sadd.s32 4294967295, %s4550_s22   ;;  %s4550_s22 = sphi %s4644_s22, %s30_s22   ;;  %s4546_s21 = sphi %s4642_s21, %s6353_s21   ;;  %s4542_s20 = sphi %s4640_s20, %s6352_s20   ;;  %s4538_s19 = sphi %s4638_s19, %s6351_s19   ;;  %s4534_s18 = sphi %s4636_s18, %s6350_s18   ;;  %s4530_s17 = sphi %s4634_s17, %s6359_s17   ;;  %s4526_s16 = sphi %s4632_s16, %s6358_s16   ;;  %s4522_s15 = sphi %s4630_s15, %s6357_s15   ;;  %s4518_s14 = sphi %s4628_s14, %s6356_s14   ;;  %s4514_s13 = sphi %s4626_s13, %s6355_s13   ;;  %s4510_s12 = sphi %s4624_s12, %s6354_s12   ;;  %s4506_s11 = sphi %s4622_s11, %s6375_s11   ;;  %s4502_s10 = sphi %s4620_s10, %s6346_s10   ;;  %s4498_s30 = sphi %s4618_s30, %s6345_s30  }
  0x1a   : > { %6175 = sst [smem:[#allocation21_spill]] %s4502_s10  ;;  %p3011_p0 = scmp.ge.s32.totalorder %s4550_s22, 1 }
  0x1b   : > { %6176 = sst [smem:[#allocation22_spill]] %s4506_s11  ;;  %p6110_p1 = scmp.eq.s32.totalorder %s4689_s23, 0 }
  0x1c   : > { %6177 = sst [smem:[#allocation23_spill]] %s4514_s13  ;;  %p301_p3 = scmp.lt.s32.totalorder %s4550_s22, 5 }
  0x1d   : > { %6178 = sst [smem:[#allocation24_spill]] %s4534_s18  ;;  %s4552_s25 = smov [#allocation8]  }
  0x1e   : > { %6179 = sst [smem:[#allocation25_spill]] %s4538_s19  ;;  %p4695_p4 = pnand %p3011_p0, %p301_p3 }
  0x1f   : > { %6180 = sst [smem:[#allocation26_spill]] %s4542_s20  ;;  %s313_s26 = sshll.u32 %s4552_s25, 4  ;;  %s314_s26 = int_to_ptr.vmem [resolvable:$true] %s313_s26 }
  0x20   : > { %6181 = sst [smem:[#allocation27_spill]] %s4546_s21  ;;  %p3954_p5 = pneg %p4695_p4 }
  0x21   : > { %s6182_s24 = scalar_select %p4695_p4, 1, 0 }
  0x22   : > { %p4703_p6 = pnand %p3954_p5, %p6110_p1  ;;  %s6185_s3 = sld [smem:[#allocation42_spill]] }
  0x23   : > { %6183 = sst [smem:[#allocation28_spill]] %s6182_s24 }
  0x24   : > { %s6184_s27 = scalar_select %p4703_p6, 1, 0 }
  0x25   : > { %p4715_p8 = pneg %p4703_p6 }
  0x28   : > { %s4214_s9 = scalar_lea.hbm %s6185_s3, 1024 }
  0x29   : > { %p4215_p7 = scmp.ne.s32.totalorder %s6185_s3, %s4214_s9  ;;  %p4221_p11 = scmp.lt.u32.totalorder %s4214_s9, %s6185_s3 }
  0x2b   : > { %p4217_p9 = pnand %p4715_p8, %p4215_p7 }
  0x2d   : > { %p4218_p10 = pneg %p4217_p9 }
  0x2f   : > { %p4223_p12 = pnand %p4221_p11, %p4218_p10 }
  0x31   : > { %4226 = shalt.err (!%p4223_p12)
}
  0x32   : > { %s4227_s28 = scalar_lea.vmem %s314_s26, 1024  ;;  %p4235_p5 = scmp.lt.s32.totalorder %s314_s26, %s314_s26 }
  0x33   : > { %p4228_p13 = scmp.ne.s32.totalorder %s314_s26, %s4227_s28  ;;  %p4236_p2 = scmp.lt.s32.totalorder %s4227_s28, %s4227_s28 }
  0x35   : > { %p4230_p0 = pnand %p4228_p13, %p4715_p8  ;;  %p4237_p1 = por %p4236_p2, %p4235_p5 }
  0x37   : > { %p4231_p3 = pneg %p4230_p0 }
  0x39   : > { %p4238_p4 = pnand %p4237_p1, %p4231_p3 }
  0x3b   : > { %4241 = shalt.err (!%p4238_p4)
}
  0x3c   : > { %s6115_s8 = smov 64   ;;  %s6117_s4 = smov 4  }
  0x3d   : > { %3957 = dma.hbm_to_vmem [thread:$0]  (!%p4703_p6), %s6185_s3, 1024, %s314_s26, [#allocation9], %s6115_s8, %s6115_s8, %s6117_s4  }
  0x3e   : > { %s39_s19 = sadd.s32 1, %s4542_s20  ;;  %s42_s29 = sadd.s32 1, %s4546_s21 }
  0x3f   : > { %p40_p1 = scmp.ge.s32.totalorder %s39_s19, 2  ;;  %p6131_p2 = scmp.eq.s32.totalorder %s4550_s22, 0 }
  0x40   : > { %s3005_s28 = sshll.u32 %s4542_s20, 3  ;;  %s87_s18 = sadd.s32 1, %s4518_s14 }
  0x41   : > { %s6361_s19 = smov (%p40_p1, %s39_s19), 0  ;;  %s6363_s29 = smov (!%p40_p1, %s42_s29), %s4546_s21 }
  0x42   : > { %6187 = sst [smem:[#allocation29_spill]] %s6361_s19  ;;  %s47_s24 = ssub.s32 %s4542_s20, %s6361_s19 }
  0x43   : > { %s3006_s2 = sadd.s32 4294967295, %s3005_s28  ;;  %p44_p4 = scmp.ge.s32.totalorder %s6363_s29, 2 }
  0x44   : > { %p76_p7 = scmp.gt.s32.totalorder %s3006_s2, 0  ;;  %s3007_s26 = sshll.u32 %s6361_s19, 3 }
  0x45   : > { %p94_p9 = scmp.ne.s32.totalorder %s4518_s14, %s4514_s13  ;;  %s6365_s29 = smov (%p44_p4, %s6363_s29), 0 }
  0x46   : > { %6188 = sst [smem:[#allocation30_spill]] %s6365_s29  ;;  %s6367_s2 = smov (!%p76_p7, %s3006_s2), 0 }
  0x47   : > { %s4751_s6 = ssub.s32 %s4546_s21, %s6365_s29  ;;  %s3008_s9 = sadd.s32 4294967295, %s3007_s26 }
  0x48   : > { %6189 = sst [smem:[#allocation31_spill]] %s4751_s6  ;;  %s4754_s8 = sor.u32 %s47_s24, %s4751_s6 }
  0x49   : > { %p80_p10 = scmp.gt.s32.totalorder %s3008_s9, 0  ;;  %p4759_p12 = por %p94_p9, %p6131_p2 }
  0x4a   : > { %p100_p13 = scmp.ne.s32.totalorder %s4514_s13, %s4510_s12  ;;  %s4765_s3 = sadd.s32 8, %s3005_s28 }
  0x4b   : > { %s6369_s9 = smov (!%p80_p10, %s3008_s9), 0  ;;  %6191 = sst [smem:[#allocation32_spill]] %s4765_s3 }
  0x4c   : > { %s83_s29 = ssub.s32 %s6367_s2, %s6369_s9  ;;  %p6192_p3 = scmp.eq.s32.totalorder %s4689_s23, 0 }
  0x4d   : > { %s84_s24 = sor.u32 %s83_s29, %s4751_s6  ;;  %s4775_s30 = sadd.s32 8, %s3007_s26 }
  0x4e   : > { %p4771_p5 = por %p100_p13, %p6192_p3  ;;  %p85_p1 = scmp.eq.s32.totalorder %s84_s24, 0 }
  0x4f   : > { %p6130_p7 = scmp.lt.s32.totalorder %s4550_s22, 4  ;;  %s4783_s28 = sshll.u32 %s4546_s21, 5 }
  0x50   : > { %s6193_s19 = scalar_select %p4771_p5, 1, 0 }
  0x51   : > { %s4780_s12 = scalar_select %p85_p1, %s4518_s14, %s87_s18  }
  0x52   : > { %6194 = sst [smem:[#allocation33_spill]] %s6193_s19  ;;  %s386_s9 = sand.u32 1, %s4550_s22  }
  0x53   : > { %s388_s29 = sand.u32 1, %s4518_s14   ;;  %s3024_s6 = sshll.u32 %s6367_s2, 1 }
  0x54   : > { %s3021_s13 = sshll.u32 %s388_s29, 4  ;;  %s400_s10 = sadd.s32 %s3024_s6, %s4783_s28 }
  0x55   : > { %s3026_s3 = sshll.u32 %s400_s10, 7  ;;  %s390_s19 = scalar_lea.vmem [#allocation5], %s3021_s13 }
  0x56   : > { %s403_s24 = sshll.u32 %s390_s19, 4  ;;  %s6195_s1 = sld [smem:[#allocation40_spill]]  ;;  %s4793_s24 = int_to_ptr.vmem [resolvable:$true] %s403_s24 }
  0x57   : > { %p4799_p9 = pnand %p6130_p7, %p4759_p12  ;;  %s4555_s2 = smov [#allocation10]  }
  0x58   : > { %s329_s10 = sshll.u32 %s4555_s2, 4  ;;  %s4805_s0 = scalar_lea.sflag [#allocation6], %s386_s9  ;;  %s4803_s10 = int_to_ptr.vmem [resolvable:$true] %s329_s10 }
  0x59   : > { %p4244_p13 = pneg %p4799_p9 }
  0x5c   : > { %s4791_s26 = scalar_lea.hbm %s6195_s1, %s3026_s3  ;;  %s4247_s4 = scalar_lea.hbm %s6195_s1, 8192 }
  0x5d   : > { %s4242_s3 = scalar_lea.hbm %s4791_s26, 256  ;;  %p4248_p12 = scmp.lt.u32.totalorder %s4791_s26, %s6195_s1 }
  0x5e   : > { %p4243_p10 = scmp.ne.s32.totalorder %s4791_s26, %s4242_s3  ;;  %p4249_p4 = scmp.lt.u32.totalorder %s4247_s4, %s4242_s3 }
  0x5f   : > { %p4251_p7 = scmp.lt.u32.totalorder %s4242_s3, %s4791_s26 }
  0x60   : > { %p4245_p3 = pnand %p4244_p13, %p4243_p10  ;;  %p4250_p0 = por %p4249_p4, %p4248_p12 }
  0x62   : > { %p4246_p1 = pneg %p4245_p3  ;;  %p4252_p2 = por %p4251_p7, %p4250_p0 }
  0x64   : > { %p4253_p11 = pnand %p4252_p2, %p4246_p1 }
  0x66   : > { %4256 = shalt.err (!%p4253_p11)
}
  0x67   : > { %s4257_s9 = scalar_lea.vmem %s4793_s24, 256  ;;  %s4556_s29 = smov [#allocation5]  }
  0x68   : > { %p4258_p10 = scmp.ne.s32.totalorder %s4793_s24, %s4257_s9  ;;  %s4262_s2 = sshll.u32 %s4556_s29, 4  ;;  %s4263_s2 = int_to_ptr.vmem [resolvable:$false] %s4262_s2 }
  0x69   : > { %s4264_s11 = scalar_lea.vmem %s4263_s2, 512  ;;  %p4265_p6 = scmp.lt.s32.totalorder %s4793_s24, %s4263_s2 }
  0x6a   : > { %p4260_p3 = pnand %p4258_p10, %p4244_p13  ;;  %p4266_p4 = scmp.lt.s32.totalorder %s4264_s11, %s4257_s9 }
  0x6c   : > { %p4261_p5 = pneg %p4260_p3  ;;  %p4267_p12 = por %p4266_p4, %p4265_p6 }
  0x6e   : > { %p4268_p0 = pnand %p4267_p12, %p4261_p5 }
  0x70   : > { %4271 = shalt.err (!%p4268_p0)
}
  0x71   : > { %s6135_s3 = smov 128   ;;  %s6137_s13 = smov 8  }
  0x72   : > { %3970 = dma.hbm_to_vmem [thread:$0]  (!%p4799_p9), %s4791_s26, 256, %s4793_s24, %s4805_s0, %s6135_s3, %s6135_s3, %s6137_s13  }
  0x73   : > { %s6197_s5 = sld [smem:[#allocation44_spill]] }
  0x79   : > { %s4272_s6 = scalar_lea.hbm %s6197_s5, 9216 }
  0x7a   : > { %p4273_p6 = scmp.ne.s32.totalorder %s6197_s5, %s4272_s6  ;;  %p4279_p5 = scmp.lt.u32.totalorder %s4272_s6, %s6197_s5 }
  0x7c   : > { %p4275_p2 = pnand %p4273_p6, %p4715_p8 }
  0x7e   : > { %p4276_p11 = pneg %p4275_p2 }
  0x80   : > { %p4281_p7 = pnand %p4279_p5, %p4276_p11 }
  0x82   : > { %4284 = shalt.err (!%p4281_p7)
}
  0x83   : > { %s4285_s24 = scalar_lea.vmem %s4803_s10, 9216  ;;  %p4293_p10 = scmp.lt.s32.totalorder %s4803_s10, %s4803_s10 }
  0x84   : > { %p4286_p9 = scmp.ne.s32.totalorder %s4803_s10, %s4285_s24  ;;  %p4294_p3 = scmp.lt.s32.totalorder %s4285_s24, %s4285_s24 }
  0x86   : > { %p4288_p13 = pnand %p4286_p9, %p4715_p8  ;;  %p4295_p4 = por %p4294_p3, %p4293_p10 }
  0x88   : > { %p4289_p1 = pneg %p4288_p13 }
  0x8a   : > { %p4296_p12 = pnand %p4295_p4, %p4289_p1 }
  0x8c   : > { %4299 = shalt.err (!%p4296_p12)
}
  0x8d   : > { %p6198_p0 = scmp.ne.s32.totalorder %s6184_s27, 0  ;;  %s6199_s26 = smov 4  }
  0x8e   : > { %s6200_s18 = smov 64   ;;  %s4559_s6 = smov [#allocation11]  }
  0x8f   : > { %3960 = dma.hbm_to_vmem [thread:$0]  (!%p6198_p0), %s6197_s5, 9216, %s4803_s10, [#allocation9], %s6200_s18, %s6200_s18, %s6199_s26  }
  0x90   : > { %s345_s9 = sshll.u32 %s4559_s6, 4  ;;  %s6201_s7 = sld [smem:[#allocation46_spill]]  ;;  %s346_s9 = int_to_ptr.vmem [resolvable:$true] %s345_s9 }
  0x96   : > { %s4300_s11 = scalar_lea.hbm %s6201_s7, 1024 }
  0x97   : > { %p4301_p6 = scmp.ne.s32.totalorder %s6201_s7, %s4300_s11  ;;  %p4307_p5 = scmp.lt.u32.totalorder %s4300_s11, %s6201_s7 }
  0x99   : > { %p4303_p2 = pnand %p4301_p6, %p4715_p8 }
  0x9b   : > { %p4304_p11 = pneg %p4303_p2 }
  0x9d   : > { %p4309_p7 = pnand %p4307_p5, %p4304_p11 }
  0x9f   : > { %4312 = shalt.err (!%p4309_p7)
}
  0xa0   : > { %s4313_s10 = scalar_lea.vmem %s346_s9, 1024  ;;  %p4321_p10 = scmp.lt.s32.totalorder %s346_s9, %s346_s9 }
  0xa1   : > { %p4314_p9 = scmp.ne.s32.totalorder %s346_s9, %s4313_s10  ;;  %p4322_p3 = scmp.lt.s32.totalorder %s4313_s10, %s4313_s10 }
  0xa3   : > { %p4316_p13 = pnand %p4314_p9, %p4715_p8  ;;  %p4323_p4 = por %p4322_p3, %p4321_p10 }
  0xa5   : > { %p4317_p1 = pneg %p4316_p13 }
  0xa7   : > { %p4324_p12 = pnand %p4323_p4, %p4317_p1 }
  0xa9   : > { %4327 = shalt.err (!%p4324_p12)
}
  0xaa   : > { %3963 = dma.hbm_to_vmem [thread:$0]  (!%p6198_p0), %s6201_s7, 1024, %s346_s9, [#allocation12], %s6200_s18, %s6200_s18, %s6199_s26  }
  0xab   : > { %s3004_s27 = sadd.s32 4294967294, %s4550_s22   ;;  %s51_s25 = sadd.s32 1, %s4530_s17 }
  0xac   : > { %p6202_p8 = scmp.eq.s32.totalorder %s4754_s8, 0  ;;  %p58_p6 = scmp.ne.s32.totalorder %s4530_s17, %s4526_s16 }
  0xad   : > { %p64_p2 = scmp.ne.s32.totalorder %s4526_s16, %s4522_s15  ;;  %p294_p11 = scmp.eq.s32.totalorder %s3004_s27, 3 }
  0xae   : > { %s4888_s13 = scalar_select %p6202_p8, %s4530_s17, %s51_s25  }
  0xaf   : > { %s362_s4 = sand.u32 1, %s4530_s17   ;;  %p6204_p5 = scmp.eq.s32.totalorder %s4550_s22, 0 }
  0xb0   : > { %6203 = sst [smem:[#allocation34_spill]] %s4888_s13  ;;  %p6205_p9 = scmp.eq.s32.totalorder %s4689_s23, 0 }
  0xb1   : > { %p60_p7 = por %p6204_p5, %p58_p6  ;;  %p6207_p1 = scmp.eq.s32.totalorder %s4689_s23, 3 }
  0xb2   : > { %p4899_p13 = por %p6205_p9, %p64_p2  ;;  %p4909_p0 = por %p294_p11, %p64_p2 }
  0xb3   : > { %p4905_p10 = por %p6207_p1, %p58_p6  ;;  %s3016_s18 = sshll.u32 %s362_s4, 7 }
  0xb4   : > { %s6209_s8 = scalar_select %p4909_p0, 1, 0 }
  0xb5   : > { %s6208_s26 = scalar_select %p4905_p10, 1, 0 }
  0xb6   : > { %6210 = sst [smem:[#allocation35_spill]] %s6209_s8  ;;  %s3340_s6 = sshll.u32 %s4542_s20, 4 }
  0xb7   : > { %s373_s9 = sadd.s32 %s3340_s6, %s4783_s28  ;;  %s366_s29 = scalar_lea.vmem [#allocation2], %s3016_s18 }
  0xb8   : > { %s376_s2 = sshll.u32 %s366_s29, 4  ;;  %s3020_s11 = sshll.u32 %s373_s9, 7  ;;  %s4915_s2 = int_to_ptr.vmem [resolvable:$true] %s376_s2 }
  0xb9   : > { %s6211_s1 = sld [smem:[#allocation39_spill]]  ;;  %p6212_p3 = scmp.lt.s32.totalorder %s4550_s22, 4 }
  0xba   : > { %s4928_s25 = scalar_lea.sflag [#allocation3], %s362_s4 }
  0xbb   : > { %p4924_p4 = pnand %p6212_p3, %p60_p7 }
  0xbd   : > { %p4330_p8 = pneg %p4924_p4 }
  0xbf   : > { %s4920_s3 = scalar_lea.hbm %s6211_s1, %s3020_s11  ;;  %s4333_s29 = scalar_lea.hbm %s6211_s1, 8192 }
  0xc0   : > { %s4328_s18 = scalar_lea.hbm %s4920_s3, 2048  ;;  %p4334_p11 = scmp.lt.u32.totalorder %s4920_s3, %s6211_s1 }
  0xc1   : > { %p4329_p12 = scmp.ne.s32.totalorder %s4920_s3, %s4328_s18  ;;  %p4335_p5 = scmp.lt.u32.totalorder %s4333_s29, %s4328_s18 }
  0xc2   : > { %p4337_p9 = scmp.lt.u32.totalorder %s4328_s18, %s4920_s3 }
  0xc3   : > { %p4331_p6 = pnand %p4330_p8, %p4329_p12  ;;  %p4336_p7 = por %p4335_p5, %p4334_p11 }
  0xc5   : > { %p4332_p2 = pneg %p4331_p6  ;;  %p4338_p1 = por %p4337_p9, %p4336_p7 }
  0xc7   : > { %p4339_p3 = pnand %p4338_p1, %p4332_p2 }
  0xc9   : > { %4342 = shalt.err (!%p4339_p3)
}
  0xca   : > { %s4343_s4 = scalar_lea.vmem %s4915_s2, 2048  ;;  %s4560_s10 = smov [#allocation2]  }
  0xcb   : > { %p4344_p12 = scmp.ne.s32.totalorder %s4915_s2, %s4343_s4  ;;  %s4348_s6 = sshll.u32 %s4560_s10, 4  ;;  %s4349_s6 = int_to_ptr.vmem [resolvable:$false] %s4348_s6 }
  0xcc   : > { %s4350_s9 = scalar_lea.vmem %s4349_s6, 4096  ;;  %p4351_p10 = scmp.lt.s32.totalorder %s4915_s2, %s4349_s6 }
  0xcd   : > { %p4346_p6 = pnand %p4344_p12, %p4330_p8  ;;  %p4352_p11 = scmp.lt.s32.totalorder %s4350_s9, %s4343_s4 }
  0xcf   : > { %p4347_p0 = pneg %p4346_p6  ;;  %p4353_p5 = por %p4352_p11, %p4351_p10 }
  0xd1   : > { %p4354_p7 = pnand %p4353_p5, %p4347_p0 }
  0xd3   : > { %4357 = shalt.err (!%p4354_p7)
}
  0xd4   : > { %s6214_s18 = smov 8   ;;  %s6215_s29 = smov 128  }
  0xd5   : > { %s6216_s11 = sld [smem:[#allocation22_spill]]  ;;  %s6217_s24 = sld [smem:[#allocation32_spill]] }
  0xd6   : > { %s6218_s10 = sld [smem:[#allocation21_spill]]  ;;  %s6220_s4 = sld [smem:[#allocation31_spill]] }
  0xd7   : > { %s6219_s6 = sld [smem:[#allocation20_spill]]  ;;  %p6222_p0 = scmp.lt.s32.totalorder %s4775_s30, 15 }
  0xd8   : > { %3967 = dma.hbm_to_vmem [thread:$0]  (!%p4924_p4), %s4920_s3, 2048, %s4915_s2, %s4928_s25, %s6215_s29, %s6215_s29, %s6214_s18  }
  0xd9   : > { %s6373_s30 = smov (!%p6222_p0, %s4775_s30), 15  ;;  %p6223_p9 = scmp.eq.s32.totalorder %s4550_s22, 0 }
  0xda   : > { %p6224_p12 = scmp.eq.s32.totalorder %s4689_s23, 0  ;;  %s6226_s13 = sld [smem:[#allocation41_spill]] }
  0xdb   : > { %s123_s27 = sadd.s32 1, %s6216_s11  ;;  %p6221_p10 = scmp.lt.s32.totalorder %s6217_s24, 15 }
  0xdc   : > { %p130_p8 = scmp.ne.s32.totalorder %s6216_s11, %s6218_s10  ;;  %s415_s1 = sand.u32 1, %s6216_s11  }
  0xdd   : > { %s6371_s24 = smov (!%p6221_p10, %s6217_s24), 15  ;;  %p136_p2 = scmp.ne.s32.totalorder %s6218_s10, %s6219_s6 }
  0xde   : > { %s119_s9 = ssub.s32 %s6371_s24, %s6373_s30  ;;  %p132_p1 = por %p130_p8, %p6223_p9 }
  0xdf   : > { %s120_s5 = sor.u32 %s119_s9, %s6220_s4  ;;  %p4976_p6 = por %p136_p2, %p6224_p12 }
  0xe0   : > { %p121_p3 = scmp.eq.s32.totalorder %s120_s5, 0  ;;  %s3027_s2 = sshll.u32 %s415_s1, 4 }
  0xe1   : > { %s6225_s7 = scalar_select %p4976_p6, 1, 0 }
  0xe2   : > { %s3029_s3 = sshll.u32 %s6371_s24, 1  ;;  %s6375_s11 = smov (!%p121_p3, %s6216_s11), %s123_s27 }
  0xe3   : > { %s427_s25 = sadd.s32 %s3029_s3, %s4783_s28  ;;  %s417_s20 = scalar_lea.vmem [#allocation7], %s3027_s2 }
  0xe4   : > { %s3031_s21 = sshll.u32 %s427_s25, 7  ;;  %s430_s10 = sshll.u32 %s417_s20, 4  ;;  %s4989_s10 = int_to_ptr.vmem [resolvable:$true] %s430_s10 }
  0xe5   : > { %s6227_s8 = smov %s6226_s13  ;;  %s4987_s4 = scalar_lea.hbm %s6226_s13, %s3031_s21 }
  0xe6   : > { %p6228_p4 = scmp.lt.s32.totalorder %s4550_s22, 4  ;;  %s4358_s28 = scalar_lea.hbm %s4987_s4, 256 }
  0xe7   : > { %p4359_p5 = scmp.ne.s32.totalorder %s4987_s4, %s4358_s28  ;;  %s4363_s13 = scalar_lea.hbm %s6227_s8, 8192 }
  0xe8   : > { %p4993_p11 = pnand %p6228_p4, %p132_p1  ;;  %p4364_p8 = scmp.lt.u32.totalorder %s4987_s4, %s6227_s8 }
  0xe9   : > { %p4365_p2 = scmp.lt.u32.totalorder %s4363_s13, %s4358_s28  ;;  %p4367_p1 = scmp.lt.u32.totalorder %s4358_s28, %s4987_s4 }
  0xea   : > { %p4360_p7 = pneg %p4993_p11 }
  0xeb   : > { %p4366_p9 = por %p4365_p2, %p4364_p8 }
  0xec   : > { %p4361_p10 = pnand %p4360_p7, %p4359_p5 }
  0xed   : > { %p4368_p3 = por %p4367_p1, %p4366_p9 }
  0xee   : > { %p4362_p0 = pneg %p4361_p10 }
  0xf0   : > { %p4369_p12 = pnand %p4368_p3, %p4362_p0 }
  0xf2   : > { %4372 = shalt.err (!%p4369_p12)
}
  0xf3   : > { %s4373_s27 = scalar_lea.vmem %s4989_s10, 256  ;;  %s4561_s9 = smov [#allocation7]  }
  0xf4   : > { %p4374_p4 = scmp.ne.s32.totalorder %s4989_s10, %s4373_s27  ;;  %s4378_s2 = sshll.u32 %s4561_s9, 4  ;;  %s4379_s2 = int_to_ptr.vmem [resolvable:$false] %s4378_s2 }
  0xf5   : > { %s4380_s3 = scalar_lea.vmem %s4379_s2, 512  ;;  %p4381_p6 = scmp.lt.s32.totalorder %s4989_s10, %s4379_s2 }
  0xf6   : > { %p4376_p5 = pnand %p4374_p4, %p4360_p7  ;;  %p4382_p8 = scmp.lt.s32.totalorder %s4380_s3, %s4373_s27 }
  0xf8   : > { %p4377_p10 = pneg %p4376_p5  ;;  %p4383_p2 = por %p4382_p8, %p4381_p6 }
  0xfa   : > { %p4384_p9 = pnand %p4383_p2, %p4377_p10 }
  0xfc   : > { %4387 = shalt.err (!%p4384_p9)
}
  0xfd   : > { %3973 = dma.hbm_to_vmem [thread:$0]  (!%p4993_p11), %s4987_s4, 256, %s4989_s10, %s4805_s0, %s6215_s29, %s6215_s29, %s6214_s18  }
  0xfe   : > { %s6230_s25 = sld [smem:[#allocation28_spill]] }
 0x104   : > { %p6231_p7 = scmp.ne.s32.totalorder %s6230_s25, 0 }
 0x106   : > { %442 = sbr.rel (%p6231_p7) target bundleno = 1179 (0x49b), region = 56 }
 0x10d   : > { %s5029_s6 = sand.u32 1, %s4526_s16  }
 0x10e   : > { %s3033_s30 = sshll.u32 %s5029_s6, 7  ;;  %s445_s28 = scalar_lea.sflag [#allocation3], %s5029_s6 }
 0x10f   : > { %s5035_s5 = scalar_lea.vmem [#allocation2], %s3033_s30 }
 0x110   : > { %4473 = dma.done.wait (%p4899_p13), %s445_s28, 2048  }
 0x111   : > { %4475 = vsyncadd (%p4899_p13), %s445_s28, 4294965248  ;;  %s6232_s0 = sld [smem:[#allocation23_spill]]  ;;  %s6233_s18 = sld [smem:[#allocation33_spill]] }
 0x112   : > { %s453_s29 = sand.u32 1, %s4689_s23  }
 0x113   : > { %s454_s20 = scalar_lea.sflag [#allocation6], %s453_s29 }
 0x117   : > { %s455_s10 = sand.u32 1, %s6232_s0   ;;  %p6234_p6 = scmp.ne.s32.totalorder %s6233_s18, 0 }
 0x118   : > { %s5043_s4 = sshll.u32 %s455_s10, 4 }
 0x119   : > { %s457_s21 = scalar_lea.vmem [#allocation5], %s5043_s4 }
 0x11a   : > { %4477 = dma.done.wait (%p6234_p6), %s454_s20, 256  }
 0x11b   : > { %4479 = vsyncadd (%p6234_p6), %s454_s20, 4294967040  ;;  %s6235_s13 = sld [smem:[#allocation21_spill]]  ;;  %p6236_p13 = scmp.ne.s32.totalorder %s6225_s7, 0 }
 0x121   : > { %s464_s1 = sand.u32 1, %s6235_s13  }
 0x122   : > { %s5051_s19 = sshll.u32 %s464_s1, 4 }
 0x123   : > { %s466_s24 = scalar_lea.vmem [#allocation7], %s5051_s19 }
 0x124   : > { %4481 = dma.done.wait (%p6236_p13), %s454_s20, 256  }
 0x125   : > { %4483 = vsyncadd (%p6236_p13), %s454_s20, 4294967040  ;;  %p6237_p11 = scmp.eq.s32.totalorder %s4689_s23, 0 }
 0x127   : > { %4485 = dma.done.wait (%p6237_p11), [#allocation9], 10240   ;;  %p6238_p0 = pmov %p6237_p11 }
 0x129   : > { %4487 = vsyncadd (%p6238_p0), [#allocation9], 4294957056  ;;  %p6239_p1 = pmov %p6238_p0 }
 0x12a   : > { %p6240_p3 = pmov %p6238_p0 }
 0x12b   : > { %4489 = dma.done.wait (%p6239_p1), [#allocation12], 1024  }
 0x12c   : > { %4491 = vsyncadd (%p6240_p3), [#allocation12], 4294966272  ;;  %v4562_v0 = vmov 0.0   ;;  %vm4563_vm0 = vmmov 0   ;;  %v5069_v1 = vld [vmem:[#allocation8] sm:$0xff]   ;;  %v5071_v2 = vld [vmem:[#allocation8 + $0x8] sm:$0xff]  }
 0x12d   : > { %3686 = vmatprep.subr.bf16.mxu1 %v4562_v0  ;;  %3702 = vmatprep.mubr.msk.bf16.mxu1 %vm4563_vm0, %v4562_v0  ;;  %v5078_v3 = vld [vmem:[#allocation8 + $0x10] sm:$0xff]   ;;  %v5084_v4 = vld [vmem:[#allocation8 + $0x18] sm:$0xff]   ;;  %v551_v5 = vld [vmem:[%s5035_s5] sm:$0xff]  ;;  %s6241_s7 = sld [smem:[#allocation24_spill]]  ;;  %s6242_s2 = sld [smem:[#allocation43_spill]]  ;;  %vm6160_vm9 = vmmov 1  }
 0x12e   : > { %3654 = vmatprep.subr.bf16.mxu0 %v5069_v1  ;;  %3687 = vmatpush3.bf16.msra.mxu1 %v5069_v1  ;;  %v552_v6 = vld [vmem:[%s5035_s5 + $0x8] sm:$0xff]  ;;  %v5092_v8 = vld [vmem:[#allocation8 + $0x20] sm:$0xff]   ;;  %v5104_v10 = vld [vmem:[#allocation8 + $0x30] sm:$0xff]   ;;  %s6337_s0 = sld [smem:[#allocation45_spill]]  ;;  %s6338_s10 = sld [smem:[#allocation47_spill]] }
 0x12f   : > { %3655 = vmatpush3.bf16.msra.mxu0 %v5069_v1  ;;  %3688 = vmatprep.subr.bf16.mxu1 %v4562_v0  ;;  %v567_v7 = vpack.c.bf16 %v552_v6, %v551_v5  ;;  %v5098_v9 = vld [vmem:[#allocation8 + $0x28] sm:$0xff]   ;;  %v5109_v11 = vld [vmem:[#allocation8 + $0x38] sm:$0xff]   ;;  %v742_v12 = vld [vmem:[%s457_s21] sm:$0xff]  ;;  %s5971_s4 = scalar_lea.vmem [#allocation13], %s3033_s30  ;;  %s6339_s30 = sld [smem:[#allocation25_spill]] }
 0x130   : > { %3656 = vmatprep.subr.bf16.mxu0 %v5071_v2  ;;  %v743_v13 = vld [vmem:[%s457_s21 + $0x8] sm:$0xff]  ;;  %v553_v14 = vld [vmem:[%s5035_s5 + $0x10] sm:$0xff]  ;;  %v555_v16 = vld [vmem:[%s5035_s5 + $0x20] sm:$0xff]  ;;  %s2835_s1 = sshll.u32 %s5971_s4, 4  ;;  %s2819_s9 = scalar_lea.sflag [#allocation4], %s5029_s6  ;;  %s6013_s1 = int_to_ptr.vmem [resolvable:$true] %s2835_s1 }
 0x131   : > { %3670 = vmatprep.mubr.bf16.mxu0 %v567_v7  ;;  %v554_v15 = vld [vmem:[%s5035_s5 + $0x18] sm:$0xff]  ;;  %v556_v17 = vld [vmem:[%s5035_s5 + $0x28] sm:$0xff]  ;;  %v4118_v18 = vld [vmem:[#allocation10 + $0x100] sm:$0xff]   ;;  %v744_v20 = vpack.c.bf16 %v743_v13, %v742_v12  ;;  %p6341_p10 = scmp.ne.s32.totalorder %s6208_s26, 0 }
 0x132   : > { %3689 = vmatpush3.bf16.msra.mxu1 %v5071_v2  ;;  %v4119_v19 = vld [vmem:[#allocation10 + $0xc0] sm:$0xff]   ;;  %v568_v21 = vpack.c.bf16 %v554_v15, %v553_v14  ;;  %v4120_v22 = vld [vmem:[#allocation10 + $0x108] sm:$0xff]   ;;  %v569_v23 = vpack.c.bf16 %v556_v17, %v555_v16  ;;  %v557_v25 = vld [vmem:[%s5035_s5 + $0x30] sm:$0xff] }
 0x133   : > { %3657 = vmatpush3.bf16.msra.mxu0 %v5071_v2  ;;  %3690 = vmatprep.subr.bf16.mxu1 %v4562_v0  ;;  %v4121_v24 = vld [vmem:[#allocation10 + $0xc8] sm:$0xff]   ;;  %v558_v26 = vld [vmem:[%s5035_s5 + $0x38] sm:$0xff]  ;;  %v4123_v27 = vld [vmem:[#allocation10 + $0x110] sm:$0xff]   ;;  %p834_p12 = scmp.gt.s32.totalorder %s6241_s7, 0  ;;  %p840_p4 = scmp.lt.s32.totalorder %s6241_s7, 1 }
 0x134   : > { %3658 = vmatprep.subr.bf16.mxu0 %v5078_v3  ;;  %v559_v28 = vld [vmem:[%s5035_s5 + $0x40] sm:$0xff]  ;;  %v560_v29 = vld [vmem:[%s5035_s5 + $0x48] sm:$0xff]  ;;  %v4124_v30 = vld [vmem:[#allocation10 + $0xd0] sm:$0xff]   ;;  %v570_v31 = vpack.c.bf16 %v558_v26, %v557_v25  ;;  %s3343_s20 = sshll.u32 %s6241_s7, 4 }
 0x135   : > { %v4126_v32 = vld [vmem:[#allocation10 + $0x118] sm:$0xff]   ;;  %v571_v33 = vpack.c.bf16 %v560_v29, %v559_v28  ;;  %v561_v35 = vld [vmem:[%s5035_s5 + $0x50] sm:$0xff]  ;;  %v4129_v37 = vld [vmem:[#allocation10 + $0x120] sm:$0xff]   ;;  %s835_s23 = scalar_select %p834_p12, 1, 0 }
 0x136   : > { %3691 = vmatpush3.bf16.msra.mxu1 %v5078_v3  ;;  %v4127_v34 = vld [vmem:[#allocation10 + $0xd8] sm:$0xff]   ;;  %v563_v38 = vld [vmem:[%s5035_s5 + $0x60] sm:$0xff]  ;;  %v564_v39 = vld [vmem:[%s5035_s5 + $0x68] sm:$0xff]  ;;  %s5192_s3 = scalar_select %p840_p4, 1, 0 }
 0x137   : > { %3659 = vmatpush3.bf16.msra.mxu0 %v5078_v3  ;;  %3692 = vmatprep.subr.bf16.mxu1 %v4562_v0  ;;  %v562_v36 = vld [vmem:[%s5035_s5 + $0x58] sm:$0xff]  ;;  %v4130_v40 = vld [vmem:[#allocation10 + $0xe0] sm:$0xff]   ;;  %v573_v42 = vpack.c.bf16 %v564_v39, %v563_v38  ;;  %v565_v43 = vld [vmem:[%s5035_s5 + $0x70] sm:$0xff]  ;;  %v836_v6 = vstv %s835_s23  ;;  %s3332_s21 = sshll.u32 %s6339_s30, 5  ;;  %s6340_s23 = sld [smem:[#allocation48_spill]] }
 0x138   : > { %3660 = vmatprep.subr.bf16.mxu0 %v5084_v4  ;;  %v572_v41 = vpack.c.bf16 %v562_v36, %v561_v35  ;;  %v566_v44 = vld [vmem:[%s5035_s5 + $0x78] sm:$0xff]  ;;  %v788_v46 = vld [vmem:[%s466_s24] sm:$0xff]  ;;  %v4125_v50 = vld [vmem:[#allocation10 + $0x148] sm:$0xff]   ;;  %vm5185_vm1 = vcmp.eq.s32.totalorder %v836_v6, 1  ;;  %s2832_s13 = sadd.s32 %s3343_s20, %s3332_s21 }
 0x139   : > { %v574_v45 = vpack.c.bf16 %v566_v44, %v565_v43  ;;  %v789_v47 = vld [vmem:[%s466_s24 + $0x8] sm:$0xff]  ;;  %v4122_v48 = vld [vmem:[#allocation10 + $0x140] sm:$0xff]   ;;  %v4128_v51 = vld [vmem:[#allocation10 + $0x150] sm:$0xff]   ;;  %v842_v44 = vstv %s5192_s3  ;;  %s3333_s19 = sshll.u32 %s2832_s13, 7 }
 0x13a   : > { %3693 = vmatpush3.bf16.msra.mxu1 %v5084_v4  ;;  %v790_v49 = vpack.c.bf16 %v789_v47, %v788_v46  ;;  %v4131_v52 = vld [vmem:[#allocation10 + $0x158] sm:$0xff]   ;;  %v4132_v53 = vld [vmem:[#allocation10 + $0x128] sm:$0xff]   ;;  %v4134_v55 = vld [vmem:[#allocation10 + $0x160] sm:$0xff]  }
 0x13b   : > { %3661 = vmatpush3.bf16.msra.mxu0 %v5084_v4  ;;  %3694 = vmatprep.subr.bf16.mxu1 %v4562_v0  ;;  %v4133_v54 = vld [vmem:[#allocation10 + $0xe8] sm:$0xff]   ;;  %v4135_v56 = vld [vmem:[#allocation10 + $0x130] sm:$0xff]   ;;  %v4138_v59 = vld [vmem:[#allocation10 + $0x138] sm:$0xff]  }
 0x13c   : > { %3662 = vmatprep.subr.bf16.mxu0 %v5092_v8  ;;  %v4136_v57 = vld [vmem:[#allocation10 + $0xf0] sm:$0xff]   ;;  %v4137_v58 = vld [vmem:[#allocation10 + $0x168] sm:$0xff]   ;;  %v4139_v60 = vld [vmem:[#allocation10 + $0xf8] sm:$0xff]  }
 0x13d   : > { %v4140_v61 = vld [vmem:[#allocation10 + $0x170] sm:$0xff]   ;;  %v4141_v62 = vld [vmem:[#allocation10 + $0x178] sm:$0xff]   ;;  %v4142_v63 = vld [vmem:[#allocation10 + $0x40] sm:$0xff]   ;;  %s6019_s27 = scalar_lea.hbm %s6340_s23, %s3333_s19 }
 0x13e   : > { %3695 = vmatpush3.bf16.msra.mxu1 %v5092_v8  ;;  %v5183_v12 = vld [vmem:[%s6242_s2] ss:$0 sm:$0xff]  ;;  %v4167_v14 = vld [vmem:[#allocation10 + $0x88] sm:$0xff]   ;;  %s4388_s2 = scalar_lea.vmem %s6013_s1, 2048 }
 0x13f   : > { %3663 = vmatpush3.bf16.msra.mxu0 %v5092_v8  ;;  %3696 = vmatprep.subr.bf16.mxu1 %v4562_v0  ;;  %p4389_p5 = scmp.ne.s32.totalorder %s6013_s1, %s4388_s2 }
 0x140   : > { %3664 = vmatprep.subr.bf16.mxu0 %v5098_v9 }
 0x141   : > { %p4390_p8 = pnand %p4389_p5, %p6341_p10 }
 0x142   : > { %3697 = vmatpush3.bf16.msra.mxu1 %v5098_v9 }
 0x143   : > { %3665 = vmatpush3.bf16.msra.mxu0 %v5098_v9  ;;  %3698 = vmatprep.subr.bf16.mxu1 %v4562_v0  ;;  %p4391_p2 = pneg %p4390_p8 }
 0x144   : > { %3666 = vmatprep.subr.bf16.mxu0 %v5104_v10 }
 0x146   : > { %3699 = vmatpush3.bf16.msra.mxu1 %v5104_v10 }
 0x147   : > { %3667 = vmatpush3.bf16.msra.mxu0 %v5104_v10  ;;  %3700 = vmatprep.subr.bf16.mxu1 %v4562_v0 }
 0x148   : > { %3668 = vmatprep.subr.bf16.mxu0 %v5109_v11 }
 0x14a   : > { %3701 = vmatpush3.bf16.msra.mxu1 %v5109_v11 }
 0x14b   : > { %3669 = vmatpush3.bf16.msra.mxu0 %v5109_v11  ;;  %3398 = vmatprep.subr.bf16.mxu1 %v4118_v18 }
 0x14c   : > { %3706 = vmatprep.subr.bf16.mxu0 %v4562_v0 }
 0x14d   : > { %3703 = vmatmul.mubr.bf16.vlgmr.msra.gmra.mrb[0].mxu1 %v744_v20 }
 0x14e   : > { %3671 = vmatmul.mubr.bf16.vlgmr.msra.gmra.mrb[0].mxu0 %v568_v21  ;;  %3399 = vmatpush3.bf16.msra.mxu1 %v4119_v19 }
 0x14f   : > { %3707 = vmatpush3.bf16.msra.mxu0 %v5069_v1  ;;  %3674 = vmatprep.mubr.bf16.mxu0 %v569_v23  ;;  %v856_v1 = vlaneseq }
 0x150   : > { %3708 = vmatprep.subr.bf16.mxu0 %v4562_v0  ;;  %3400 = vmatprep.subr.bf16.mxu1 %v4120_v22 }
 0x152   : > { %3401 = vmatpush3.bf16.msra.mxu1 %v4121_v24 }
 0x153   : > { %3709 = vmatpush3.bf16.msra.mxu0 %v5071_v2  ;;  %3402 = vmatprep.subr.bf16.mxu1 %v4123_v27  ;;  %v5159_v2 = vshrl.u32 %v856_v1, 7 }
 0x154   : > { %3710 = vmatprep.subr.bf16.mxu0 %v4562_v0 }
 0x155   : > { %v862_v5 = vadd.s32 40, %v5159_v2  ;;  %v5165_v7 = vadd.s32 32, %v5159_v2  ;;  %vm6147_vm2 = vcmp.lt.s32.totalorder %v5159_v2, 1  ;;  %v5195_v20 = vadd.s32 104, %v5159_v2 }
 0x156   : > { %3675 = vmatmul.mubr.bf16.gmra.mrb[4].mxu0 %v570_v31  ;;  %3403 = vmatpush3.bf16.msra.mxu1 %v4124_v30  ;;  %vm6159_vm3 = vcmp.lt.s32.totalorder %v5159_v2, 7  ;;  %v5208_v31 = vadd.s32 64, %v5159_v2  ;;  %v5219_v39 = vadd.s32 80, %v5159_v2 }
 0x157   : > { %3711 = vmatpush3.bf16.msra.mxu0 %v5078_v3  ;;  %3678 = vmatprep.mubr.bf16.mxu0 %v571_v33  ;;  %v859_v3 = vadd.s32 16, %v5159_v2  ;;  %v916_v16 = vand.u32 15, %v862_v5  ;;  %v909_v18 = vand.u32 15, %v5165_v7  ;;  %v5214_v33 = vadd.s32 136, %v5159_v2 }
 0x158   : > { %3712 = vmatprep.subr.bf16.mxu0 %v4562_v0  ;;  %3404 = vmatprep.subr.bf16.mxu1 %v4126_v32  ;;  %v5211_v32 = vadd.s32 120, %v5159_v2 }
 0x159   : > { %v895_v13 = vand.u32 15, %v859_v3  ;;  %vm5238_vm6 = vcmp.ne.s32.totalorder %v916_v16, 15  ;;  %vm5271_vm8 = vcmp.ne.s32.totalorder %v909_v18, 0 }
 0x15a   : > { %3405 = vmatpush3.bf16.msra.mxu1 %v4127_v34  ;;  %vm5349_vm14 = vmpackc.low %vm5238_vm6, %vm6160_vm9 }
 0x15b   : > { %3713 = vmatpush3.bf16.msra.mxu0 %v5084_v4  ;;  %3406 = vmatprep.subr.bf16.mxu1 %v4129_v37  ;;  %v860_v4 = vadd.s32 24, %v5159_v2  ;;  %vm5203_vm4 = vcmp.ne.s32.totalorder %v895_v13, 0 }
 0x15c   : > { %3714 = vmatprep.subr.bf16.mxu0 %v4562_v0  ;;  %vm5296_vm10 = vmpackc.low %vm6160_vm9, %vm5203_vm4 }
 0x15d   : > { %v902_v15 = vand.u32 15, %v860_v4  ;;  %vm5405_vm4 = vmpackc.low %vm6160_vm9, %vm5271_vm8 }
 0x15e   : > { %3679 = vmatmul.mubr.bf16.gmra.mrb[8].mxu0 %v572_v41  ;;  %3407 = vmatpush3.bf16.msra.mxu1 %v4130_v40 }
 0x15f   : > { %3715 = vmatpush3.bf16.msra.mxu0 %v5092_v8  ;;  %3682 = vmatprep.mubr.bf16.mxu0 %v573_v42  ;;  %v5168_v8 = vadd.s32 56, %v5159_v2  ;;  %vm5224_vm5 = vcmp.ne.s32.totalorder %v902_v15, 15 }
 0x160   : > { %3716 = vmatprep.subr.bf16.mxu0 %v4562_v0  ;;  %3408 = vmatprep.subr.bf16.mxu1 %v4132_v53  ;;  %v986_v53 = vand.u32 15, %v5211_v32  ;;  %vm5324_vm12 = vmpackc.low %vm5224_vm5, %vm6160_vm9  ;;  %v6275_v32 = vmov 0 }
 0x161   : > { %v930_v19 = vand.u32 15, %v5168_v8 }
 0x162   : > { %3409 = vmatpush3.bf16.msra.mxu1 %v4133_v54  ;;  %vm5451_vm6 = vcmp.ne.s32.totalorder %v986_v53, 15  ;;  %v4147_v53 = vld [vmem:[#allocation10 + $0x10] sm:$0xff]  }
 0x163   : > { %3717 = vmatpush3.bf16.msra.mxu0 %v5098_v9  ;;  %3410 = vmatprep.subr.bf16.mxu1 %v4135_v56  ;;  %v5172_v9 = vadd.s32 72, %v5159_v2  ;;  %vm5259_vm7 = vcmp.ne.s32.totalorder %v930_v19, 15 }
 0x164   : > { %3718 = vmatprep.subr.bf16.mxu0 %v4562_v0 }
 0x165   : > { %v944_v24 = vand.u32 15, %v5172_v9  ;;  %v4160_v9 = vld [vmem:[#allocation10 + $0x1c8] sm:$0xff]  }
 0x166   : > { %3683 = vmatmul.mubr.bf16.gmra.mrb[12].mxu0 %v574_v45  ;;  %3411 = vmatpush3.bf16.msra.mxu1 %v4136_v57  ;;  %v972_v45 = vand.u32 15, %v5195_v20 }
 0x167   : > { %3719 = vmatpush3.bf16.msra.mxu0 %v5104_v10  ;;  %3722 = vmatprep.mubr.msk.bf16.mxu0 %vm4563_vm0, %v4562_v0  ;;  %v5175_v10 = vadd.s32 48, %v5159_v2  ;;  %vm5313_vm11 = vcmp.ne.s32.totalorder %v944_v24, 15  ;;  %vm5397_vm0 = vmpackc.low %vm5259_vm7, %vm6160_vm9 }
 0x168   : > { %3720 = vmatprep.subr.bf16.mxu0 %v4562_v0  ;;  %3412 = vmatprep.subr.bf16.mxu1 %v4138_v59  ;;  %v4156_v0 = vld [vmem:[#allocation10 + $0x1c0] sm:$0xff]   ;;  %vm5421_vm5 = vcmp.ne.s32.totalorder %v972_v45, 15  ;;  %vm5465_vm7 = vmpackc.low %vm5313_vm11, %vm6160_vm9 }
 0x169   : > { %v923_v25 = vand.u32 15, %v5175_v10  ;;  %v6276_v32 = vsel %vm5465_vm7, 4294967295, %v6275_v32 }
 0x16a   : > { %3413 = vmatpush3.bf16.msra.mxu1 %v4139_v60  ;;  %6277 = vst [vmem:[#allocation36_spill] sm:$0xff] %v6276_v32 }
 0x16b   : > { %3721 = vmatpush3.bf16.msra.mxu0 %v5109_v11  ;;  %3558 = vmatprep.subr.bf16.mxu1 %v4156_v0  ;;  %v5178_v11 = vadd.s32 88, %v5159_v2  ;;  %vm5369_vm15 = vcmp.ne.s32.totalorder %v923_v25, 0  ;;  %v4163_v25 = vld [vmem:[#allocation10 + $0x1d0] sm:$0xff]  }
 0x16c   : > { %3726 = vmatprep.subr.bf16.mxu0 %v4122_v48 }
 0x16d   : > { %v958_v26 = vand.u32 15, %v5178_v11 }
 0x16e   : > { %3723 = vmatmul.mubr.bf16.vlgmr.msra.gmra.mrb[16].mxu0 %v790_v49 }
 0x16f   : > { %3727 = vmatpush3.bf16.msra.mxu0 %v4122_v48  ;;  %vm5339_vm13 = vcmp.ne.s32.totalorder %v958_v26, 15 }
 0x170   : > { %3728 = vmatprep.subr.bf16.mxu0 %v4125_v50  ;;  %vm5495_vm11 = vmpackc.low %vm5339_vm13, %vm6160_vm9 }
 0x173   : > { %3729 = vmatpush3.bf16.msra.mxu0 %v4125_v50 }
 0x174   : > { %3730 = vmatprep.subr.bf16.mxu0 %v4128_v51 }
 0x177   : > { %3731 = vmatpush3.bf16.msra.mxu0 %v4128_v51 }
 0x178   : > { %3732 = vmatprep.subr.bf16.mxu0 %v4131_v52 }
 0x17b   : > { %3733 = vmatpush3.bf16.msra.mxu0 %v4131_v52  ;;  %v937_v52 = vand.u32 15, %v5208_v31  ;;  %v6280_v31 = vmov 0 }
 0x17c   : > { %3734 = vmatprep.subr.bf16.mxu0 %v4134_v55  ;;  %v6281_v31 = vsel %vm5495_vm11, 4294967295, %v6280_v31 }
 0x17d   : > { %vm5480_vm8 = vcmp.ne.s32.totalorder %v937_v52, 0  ;;  %6282 = vst [vmem:[#allocation37_spill] sm:$0xff] %v6281_v31  ;;  %v4188_v52 = vld [vmem:[#allocation10 + $0x230] sm:$0xff]  }
 0x17f   : > { %3735 = vmatpush3.bf16.msra.mxu0 %v4134_v55 }
 0x180   : > { %3736 = vmatprep.subr.bf16.mxu0 %v4137_v58 }
 0x183   : > { %3737 = vmatpush3.bf16.msra.mxu0 %v4137_v58 }
 0x184   : > { %3738 = vmatprep.subr.bf16.mxu0 %v4140_v61 }
 0x187   : > { %3739 = vmatpush3.bf16.msra.mxu0 %v4140_v61 }
 0x188   : > { %3740 = vmatprep.subr.bf16.mxu0 %v4141_v62 }
 0x18b   : > { %3741 = vmatpush3.bf16.msra.mxu0 %v4141_v62 }
 0x18c   : > { %3478 = vmatprep.subr.bf16.mxu0 %v4142_v63 }
 0x220   : > { %v779_v17 = vpop.f32.mrb[0].mxu1 }
 0x221   : > { %v780_v21 = vadd.f32 %v5183_v12, %v779_v17  ;;  %v3672_v22 = vpop.f32.mrb[0].mxu0  ;;  %v3704_v23 = vpop.f32.mrb[1].mxu1 }
 0x222   : > { %v672_v27 = vadd.f32 %v3672_v22, %v5183_v12  ;;  %v663_v28 = vpop.f32.mrb[1].mxu0  ;;  %v782_v29 = vpop.f32.mrb[2].mxu1 }
 0x223   : > { %v786_v34 = vmax.f32 %v780_v21, 0.0  ;;  %v664_v35 = vadd.f32 %v5183_v12, %v663_v28  ;;  %v783_v36 = vadd.f32 %v5183_v12, %v782_v29  ;;  %v3673_v37 = vpop.f32.mrb[2].mxu0  ;;  %v3705_v38 = vpop.f32.mrb[3].mxu1 }
 0x224   : > { %v5221_v40 = vmax.f32 %v672_v27, 0.0  ;;  %v675_v41 = vadd.f32 %v3673_v37, %v5183_v12  ;;  %v666_v42 = vpop.f32.mrb[3].mxu0 }
 0x225   : > { %v5232_v46 = vsel %vm5185_vm1, %v786_v34, 0.0  ;;  %v5234_v47 = vmax.f32 %v664_v35, 0.0  ;;  %v787_v48 = vmax.f32 %v783_v36, 0.0  ;;  %v667_v49 = vadd.f32 %v5183_v12, %v666_v42 }
 0x226   : > { %v6145_v50 = vrot.slane %v5232_v46, 7  ;;  %v729_v61 = vmax.f32 %v675_v41, 0.0  ;;  %v1141_v63 = vrot.slane %v5221_v40, 7  ;;  %v1272_v0 = vrot.slane %v5221_v40, 1  ;;  %v4179_v41 = vld [vmem:[#allocation10 + $0xa8] sm:$0xff]  }
 0x227   : > { %v1139_v55 = vrot.slane %v5234_v47, 7  ;;  %v5248_v56 = vsel %vm5185_vm1, %v787_v48, 0.0  ;;  %v5250_v57 = vpack.c.bf16 %v787_v48, %v786_v34  ;;  %v727_v62 = vmax.f32 %v667_v49, 0.0 }
 0x228   : > { %v1138_v60 = vrot.slane %v5248_v56, 7  ;;  %v6146_v1 = vrot.slane %v5234_v47, 1  ;;  %v1142_v8 = vrot.slane %v729_v61, 7  ;;  %v1273_v13 = vrot.slane %v729_v61, 1 }
 0x229   : > { %v3676_v4 = vpop.f32.mrb[4].mxu0  ;;  %v1140_v17 = vrot.slane %v727_v62, 7  ;;  %v1271_v19 = vrot.slane %v727_v62, 1  ;;  %v5281_v29 = vpack.c.bf16 %v727_v62, %v5234_v47  ;;  %v5284_v18 = vpack.c.bf16 %v729_v61, %v5221_v40 }
 0x22a   : > { %v1175_v6 = vsel %vm6147_vm2, %v1138_v60, %v1139_v55  ;;  %v5269_v7 = vsel %vm6147_vm2, %v6145_v50, %v1138_v60  ;;  %v679_v15 = vpop.f32.mrb[5].mxu0  ;;  %v688_v21 = vadd.f32 %v3676_v4, %v5183_v12  ;;  %v1303_v27 = vsel %vm6159_vm3, %v1272_v0, %v1273_v13 }
 0x22b   : > { %v680_v22 = vadd.f32 %v5183_v12, %v679_v15  ;;  %v3677_v23 = vpop.f32.mrb[6].mxu0  ;;  %v1174_v35 = vsel %vm6147_vm2, %v1139_v55, %v1140_v17  ;;  %1652 = vmatprep.mubr.bf16.mxu1 %v5281_v29  ;;  %v1304_v48 = vsel %vm6159_vm3, %v1271_v19, %v1272_v0  ;;  %v1305_v49 = vsel %vm6159_vm3, %v6146_v1, %v1271_v19  ;;  %v4157_v55 = vld [vmem:[#allocation10 + $0x180] sm:$0xff]   ;;  %v4148_v1 = vld [vmem:[#allocation10 + $0x58] sm:$0xff]  }
 0x22c   : > { %v691_v28 = vadd.f32 %v3677_v23, %v5183_v12  ;;  %v682_v34 = vpop.f32.mrb[7].mxu0  ;;  %v5288_v36 = vmax.f32 %v688_v21, 0.0  ;;  %v5300_v42 = vpack.c.bf16 %v1174_v35, %v1175_v6  ;;  %v5335_v19 = vpack.c.bf16 %v1304_v48, %v1305_v49  ;;  %v4144_v49 = vld [vmem:[#allocation10 + $0x48] sm:$0xff]  }
 0x22d   : > { %v5290_v37 = vmax.f32 %v680_v22, 0.0  ;;  %v683_v38 = vadd.f32 %v5183_v12, %v682_v34  ;;  %v1172_v11 = vsel %vm6147_vm2, %v1141_v63, %v1142_v8  ;;  %v1173_v26 = vsel %vm6147_vm2, %v1140_v17, %v1141_v63  ;;  %v4150_v63 = vld [vmem:[#allocation10 + $0x60] sm:$0xff]  }
 0x22e   : > { %v5302_v40 = vmax.f32 %v691_v28, 0.0  ;;  %v1145_v60 = vrot.slane %v5288_v36, 7  ;;  %v1276_v61 = vrot.slane %v5288_v36, 1  ;;  %3076 = vmatmul.mubr.msk.bf16.vlgmr.msra.gmra.mrb[4].mxu1 %vm5296_vm10, %v5300_v42  ;;  %v4143_v28 = vld [vmem:[#allocation10] sm:$0xff]   ;;  %3742 = vmatprep.mubr.msk.bf16.mxu0 %vm5324_vm12, %v5335_v19  ;;  %v876_v23 = vadd.s32 152, %v5159_v2 }
 0x22f   : > { %v1143_v62 = vrot.slane %v5290_v37, 7  ;;  %v1274_v0 = vrot.slane %v5290_v37, 1  ;;  %v5330_v15 = vmax.f32 %v683_v38, 0.0  ;;  %1660 = vmatprep.mubr.bf16.mxu1 %v5284_v18  ;;  %3559 = vmatpush3.bf16.msra.mxu1 %v4157_v55 }
 0x230   : > { %v1146_v24 = vrot.slane %v5302_v40, 7  ;;  %v1277_v6 = vrot.slane %v5302_v40, 1  ;;  %3560 = vmatprep.subr.bf16.mxu1 %v4160_v9  ;;  %v6267_v9 = vmov 0 }
 0x231   : > { %v1302_v21 = vsel %vm6159_vm3, %v1273_v13, %v1274_v0  ;;  %v3680_v22 = vpop.f32.mrb[8].mxu0  ;;  %v1171_v13 = vsel %vm6147_vm2, %v1142_v8, %v1143_v62  ;;  %v1144_v35 = vrot.slane %v5330_v15, 7  ;;  %v1275_v51 = vrot.slane %v5330_v15, 1  ;;  %v4161_v8 = vld [vmem:[#allocation10 + $0x188] sm:$0xff]  }
 0x232   : > { %v5359_v34 = vpack.c.bf16 %v1302_v21, %v1303_v27  ;;  %v704_v38 = vadd.f32 %v3680_v22, %v5183_v12  ;;  %v695_v48 = vpop.f32.mrb[9].mxu0  ;;  %v5374_v21 = vpack.c.bf16 %v1172_v11, %v1173_v26  ;;  %v5378_v50 = vpack.c.bf16 %v5330_v15, %v5290_v37 }
 0x233   : > { %v696_v17 = vadd.f32 %v5183_v12, %v695_v48  ;;  %v3681_v27 = vpop.f32.mrb[10].mxu0  ;;  %v1299_v10 = vsel %vm6159_vm3, %v1276_v61, %v1277_v6  ;;  %v1300_v37 = vsel %vm6159_vm3, %v1275_v51, %v1276_v61  ;;  %v1301_v15 = vsel %vm6159_vm3, %v1274_v0, %v1275_v51  ;;  %v4145_v0 = vld [vmem:[#allocation10 + $0x8] sm:$0xff]   ;;  %3561 = vmatpush3.bf16.msra.mxu1 %v4161_v8 }
 0x234   : > { %v5384_v22 = vmax.f32 %v704_v38, 0.0  ;;  %v707_v55 = vadd.f32 %v3681_v27, %v5183_v12  ;;  %v698_v58 = vpop.f32.mrb[11].mxu0  ;;  %3743 = vmatmul.mubr.msk.bf16.vlgmr.msra.gmra.mrb[20].mxu0 %vm5349_vm14, %v5359_v34  ;;  %v6268_v9 = vsel %vm5397_vm0, 4294967295, %v6267_v9  ;;  %v5409_v61 = vpack.c.bf16 %v1300_v37, %v1301_v15  ;;  %3562 = vmatprep.subr.bf16.mxu1 %v4163_v25  ;;  %v4165_v15 = vld [vmem:[#allocation10 + $0x1d8] sm:$0xff]   ;;  %v4184_v38 = vld [vmem:[#allocation10 + $0x210] sm:$0xff]  }
 0x235   : > { %v734_v11 = vmax.f32 %v696_v17, 0.0  ;;  %v699_v26 = vadd.f32 %v5183_v12, %v698_v58  ;;  %3479 = vmatpush3.bf16.msra.mxu0 %v4143_v28  ;;  %v1170_v5 = vsel %vm6147_vm2, %v1143_v62, %v1144_v35  ;;  %v4146_v58 = vld [vmem:[#allocation10 + $0x50] sm:$0xff]   ;;  %v1168_v8 = vsel %vm6147_vm2, %v1145_v60, %v1146_v24 }
 0x236   : > { %v1149_v51 = vrot.slane %v5384_v22, 7  ;;  %v1280_v48 = vrot.slane %v5384_v22, 1  ;;  %v5415_v17 = vmax.f32 %v707_v55, 0.0  ;;  %3480 = vmatprep.subr.bf16.mxu0 %v4144_v49  ;;  %v5417_v16 = vpack.c.bf16 %v1170_v5, %v1171_v13  ;;  %3746 = vmatprep.mubr.msk.bf16.mxu0 %vm5397_vm0, %v5409_v61  ;;  %v4164_v13 = vld [vmem:[#allocation10 + $0x190] sm:$0xff]  }
 0x237   : > { %v1147_v27 = vrot.slane %v734_v11, 7  ;;  %v1278_v37 = vrot.slane %v734_v11, 1  ;;  %v5425_v62 = vmax.f32 %v699_v26, 0.0  ;;  %v5432_v49 = vpack.c.bf16 %v5302_v40, %v5288_v36  ;;  %3080 = vmatmul.mubr.msk.bf16.gmra.mrb[8].mxu1 %vm5405_vm4, %v5374_v21 }
 0x238   : > { %v6150_v20 = vrot.slane %v5415_v17, 7  ;;  %v1281_v45 = vrot.slane %v5415_v17, 1  ;;  %v1169_v25 = vsel %vm6147_vm2, %v1144_v35, %v1145_v60  ;;  %1668 = vmatprep.mubr.bf16.mxu1 %v5378_v50  ;;  %vm5501_vm2 = vcmp.eq.s32.totalorder %v842_v44, 1  ;;  %3563 = vmatpush3.bf16.msra.mxu1 %v4164_v13 }
 0x239   : > { %v1148_v26 = vrot.slane %v5425_v62, 7  ;;  %v1279_v5 = vrot.slane %v5425_v62, 1  ;;  %v3684_v59 = vpop.f32.mrb[12].mxu0  ;;  %3481 = vmatpush3.bf16.msra.mxu0 %v4145_v0  ;;  %v1298_v36 = vsel %vm6159_vm3, %v1277_v6, %v1278_v37  ;;  %v5469_v60 = vpack.c.bf16 %v1168_v8, %v1169_v25  ;;  %3564 = vmatprep.subr.bf16.mxu1 %v4165_v15 }
 0x23a   : > { %v720_v35 = vadd.f32 %v3684_v59, %v5183_v12  ;;  %v711_v3 = vpop.f32.mrb[13].mxu0  ;;  %v5472_v0 = vpack.c.bf16 %v1298_v36, %v1299_v10  ;;  %3482 = vmatprep.subr.bf16.mxu0 %v4146_v58  ;;  %v1295_v30 = vsel %vm6159_vm3, %v1280_v48, %v1281_v45  ;;  %v5485_v8 = vpack.c.bf16 %v5425_v62, %v734_v11  ;;  %v4166_v11 = vld [vmem:[#allocation10 + $0x198] sm:$0xff]  }
 0x23b   : > { %v712_v59 = vadd.f32 %v5183_v12, %v711_v3  ;;  %v3685_v10 = vpop.f32.mrb[14].mxu0  ;;  %v1296_v58 = vsel %vm6159_vm3, %v1279_v5, %v1280_v48  ;;  %v1297_v25 = vsel %vm6159_vm3, %v1278_v37, %v1279_v5  ;;  %vm6285_vm0 = vcmp.lt.s32.totalorder %v5159_v2, 1  ;;  %v4168_v5 = vld [vmem:[#allocation10 + $0x1e0] sm:$0xff]  }
 0x23c   : > { %v1166_v3 = vsel %vm6285_vm0, %v1147_v27, %v1148_v26  ;;  %v5507_v48 = vmax.f32 %v720_v35, 0.0  ;;  %v723_v37 = vadd.f32 %v3685_v10, %v5183_v12  ;;  %v714_v62 = vpop.f32.mrb[15].mxu0  ;;  %3747 = vmatmul.mubr.msk.bf16.gmra.mrb[24].mxu0 %vm5465_vm7, %v5472_v0  ;;  %v5513_v43 = vpack.c.bf16 %v1296_v58, %v1297_v25  ;;  %vm6287_vm13 = vmmov %vm6285_vm0  ;;  %v4149_v10 = vld [vmem:[#allocation10 + $0x18] sm:$0xff]   ;;  %3565 = vmatpush3.bf16.msra.mxu1 %v4166_v11  ;;  %v6334_v35 = vld [vmem:[#allocation37_spill] sm:$0xff] }
 0x23d   : > { %v1167_v44 = vsel %vm6287_vm13, %v1146_v24, %v1147_v27  ;;  %v738_v13 = vmax.f32 %v712_v59, 0.0  ;;  %v715_v36 = vadd.f32 %v5183_v12, %v714_v62  ;;  %3483 = vmatpush3.bf16.msra.mxu0 %v4147_v53  ;;  %vm5523_vm0 = vmpackc.low %vm6160_vm9, %vm5369_vm15  ;;  %v5531_v40 = vpack.c.bf16 %v5415_v17, %v5384_v22  ;;  %v4169_v62 = vld [vmem:[#allocation10 + $0x1a0] sm:$0xff]   ;;  %3566 = vmatprep.subr.bf16.mxu1 %v4168_v5  ;;  %v4170_v22 = vld [vmem:[#allocation10 + $0x1e8] sm:$0xff]  }
 0x23e   : > { %6286 = vst [vmem:[#allocation38_spill] sm:$0xff] %v5513_v43  ;;  %v5527_v58 = vpack.c.bf16 %v1166_v3, %v1167_v44  ;;  %v1153_v24 = vrot.slane %v5507_v48, 7  ;;  %v1284_v27 = vrot.slane %v5507_v48, 1  ;;  %v5535_v15 = vmax.f32 %v723_v37, 0.0  ;;  %3750 = vmatprep.mubr.msk.bf16.mxu0 %vm5495_vm11, %v5513_v43  ;;  %3484 = vmatprep.subr.bf16.mxu0 %v4148_v1  ;;  %vm6290_vm15 = vmmov %vm6287_vm13 }
 0x23f   : > { %v1164_v53 = vsel %vm6290_vm15, %v1149_v51, %v6150_v20  ;;  %v1151_v59 = vrot.slane %v738_v13, 7  ;;  %v1282_v25 = vrot.slane %v738_v13, 1  ;;  %v739_v3 = vmax.f32 %v715_v36, 0.0  ;;  %3084 = vmatmul.mubr.msk.bf16.gmra.mrb[12].mxu1 %vm5523_vm0, %v5417_v16  ;;  %vm5569_vm15 = vmpackc.low %vm5421_vm5, %vm6160_vm9 }
 0x240   : > { %v1165_v37 = vsel %vm6287_vm13, %v1148_v26, %v1149_v51  ;;  %v5559_v36 = vpack.c.bf16 %v5535_v15, %v5507_v48  ;;  %1676 = vmatprep.mubr.bf16.mxu1 %v5432_v49  ;;  %v4151_v48 = vld [vmem:[#allocation10 + $0x20] sm:$0xff]   ;;  %v6293_v31 = vrot.slane %v5535_v15, 1  ;;  %v6294_v28 = vrot.slane %v5415_v17, 7  ;;  %vm6295_vm5 = vmmov %vm6287_vm13  ;;  %3567 = vmatpush3.bf16.msra.mxu1 %v4169_v62 }
 0x241   : > { %v5555_v54 = vpack.c.bf16 %v1164_v53, %v1165_v37  ;;  %v1152_v20 = vrot.slane %v739_v3, 7  ;;  %v1283_v51 = vrot.slane %v739_v3, 1  ;;  %v825_v26 = vpop.f32.mrb[16].mxu0  ;;  %3485 = vmatpush3.bf16.msra.mxu0 %v4149_v10  ;;  %v1294_v11 = vsel %vm6159_vm3, %v1281_v45, %v1282_v25  ;;  %v4152_v10 = vld [vmem:[#allocation10 + $0x68] sm:$0xff]   ;;  %vm5593_vm13 = vmpackc.low %vm5451_vm6, %vm6160_vm9  ;;  %3568 = vmatprep.subr.bf16.mxu1 %v4170_v22 }
 0x242   : > { %v5573_v53 = vpack.c.bf16 %v739_v3, %v738_v13  ;;  %v826_v37 = vadd.f32 %v5183_v12, %v825_v26  ;;  %v3724_v1 = vpop.f32.mrb[17].mxu0  ;;  %v5576_v44 = vpack.c.bf16 %v1294_v11, %v1295_v30  ;;  %3486 = vmatprep.subr.bf16.mxu0 %v4150_v63  ;;  %v1291_v45 = vsel %vm6159_vm3, %v1284_v27, %v6293_v31  ;;  %vm6298_vm11 = vmmov %vm6295_vm5  ;;  %v4171_v31 = vld [vmem:[#allocation10 + $0x1a8] sm:$0xff]  }
 0x243   : > { %v1163_v43 = vsel %vm6295_vm5, %v6294_v28, %v1151_v59  ;;  %v828_v32 = vpop.f32.mrb[18].mxu0  ;;  %v1292_v13 = vsel %vm6159_vm3, %v1283_v51, %v1284_v27  ;;  %v1293_v30 = vsel %vm6159_vm3, %v1282_v25, %v1283_v51  ;;  %v6296_v63 = vmov 0  ;;  %vm5614_vm6 = vmpackc.low %vm6160_vm9, %vm5480_vm8 }
 0x244   : > { %v6297_v63 = vsel %vm5593_vm13, 4294967295, %v6296_v63  ;;  %v1162_v17 = vsel %vm6298_vm11, %v1151_v59, %v1152_v20  ;;  %v6299_v3 = vrot.slane %v5535_v15, 7  ;;  %v832_v1 = vmax.f32 %v826_v37, 0.0  ;;  %v3725_v51 = vpop.f32.mrb[19].mxu0  ;;  %3751 = vmatmul.mubr.msk.bf16.gmra.mrb[28].mxu0 %vm5569_vm15, %v5576_v44  ;;  %v4173_v59 = vld [vmem:[#allocation10 + $0x1f0] sm:$0xff]   ;;  %3569 = vmatpush3.bf16.msra.mxu1 %v4171_v31 }
 0x245   : > { %v829_v25 = vadd.f32 %v5183_v12, %v828_v32  ;;  %v5607_v55 = vpack.c.bf16 %v1292_v13, %v1293_v30  ;;  %v5609_v26 = vpack.c.bf16 %v1162_v17, %v1163_v43  ;;  %3487 = vmatpush3.bf16.msra.mxu0 %v4151_v48  ;;  %v4153_v12 = vld [vmem:[#allocation10 + $0x28] sm:$0xff]   ;;  %v6302_v32 = vand.u32 15, %v5214_v33  ;;  %3570 = vmatprep.subr.bf16.mxu1 %v4173_v59 }
 0x246   : > { %v1160_v27 = vsel %vm6295_vm5, %v1153_v24, %v6299_v3  ;;  %v1161_v43 = vsel %vm6295_vm5, %v1152_v20, %v1153_v24  ;;  %v6305_v22 = vrot.slane %v5234_v47, 1  ;;  %v6306_v48 = vrot.slane %v5248_v56, 1  ;;  %3488 = vmatprep.subr.bf16.mxu0 %v4152_v10  ;;  %v4154_v47 = vld [vmem:[#allocation10 + $0x70] sm:$0xff]   ;;  %v4175_v10 = vld [vmem:[#allocation10 + $0x1f8] sm:$0xff]  }
 0x247   : > { %vm5620_vm11 = vcmp.ne.s32.totalorder %v6302_v32, 15  ;;  %v6308_v28 = vrot.slane %v5232_v46, 1  ;;  %v844_v13 = vsel %vm5501_vm2, %v832_v1, 0.0  ;;  %v833_v20 = vmax.f32 %v829_v25, 0.0  ;;  %3754 = vmatprep.mubr.msk.bf16.mxu0 %vm5593_vm13, %v5607_v55  ;;  %v4174_v3 = vld [vmem:[#allocation10 + $0x1b0] sm:$0xff]   ;;  %3088 = vmatmul.mubr.msk.bf16.gmra.mrb[16].mxu1 %vm5614_vm6, %v5469_v60 }
 0x248   : > { %v5632_v6 = vsel %vm6159_vm3, %v6306_v48, %v6305_v22  ;;  %v6307_v37 = vmov %v6306_v48  ;;  %v5647_v24 = vpack.c.bf16 %v1160_v27, %v1161_v43  ;;  %v1155_v30 = vrot.slane %v844_v13, 7  ;;  %1684 = vmatprep.mubr.bf16.mxu1 %v5485_v8  ;;  %vm5666_vm8 = vmpackc.low %vm5620_vm11, %vm6160_vm9  ;;  %v4155_v22 = vld [vmem:[#allocation10 + $0x30] sm:$0xff]   ;;  %3571 = vmatpush3.bf16.msra.mxu1 %v4174_v3  ;;  %v4162_v3 = vld [vmem:[#allocation10 + $0x80] sm:$0xff]  }
 0x249   : > { %v5640_v33 = vsel %vm6159_vm3, %v6308_v28, %v6307_v37  ;;  %v1286_v17 = vrot.slane %v844_v13, 1  ;;  %v845_v51 = vsel %vm5501_vm2, %v833_v20, 0.0  ;;  %v5653_v32 = vpack.c.bf16 %v833_v20, %v832_v1  ;;  %3489 = vmatpush3.bf16.msra.mxu0 %v4153_v12  ;;  %v4158_v28 = vld [vmem:[#allocation10 + $0x78] sm:$0xff]   ;;  %vm6317_vm9 = vmmov %vm6295_vm5  ;;  %3572 = vmatprep.subr.bf16.mxu1 %v4175_v10 }
 0x24a   : > { %v3198_v56 = vpack.c.bf16 %v5632_v6, %v5640_v33  ;;  %v1156_v27 = vrot.slane %v845_v51, 7  ;;  %v1287_v25 = vrot.slane %v845_v51, 1  ;;  %v6309_v43 = vrot.slane %v5535_v15, 1  ;;  %3490 = vmatprep.subr.bf16.mxu0 %v4154_v47  ;;  %v4176_v47 = vld [vmem:[#allocation10 + $0x1b8] sm:$0xff]  }
 0x24b   : > { %v6312_v59 = vrot.slane %v5535_v15, 7  ;;  %v6313_v11 = vand.u32 15, %v5219_v39  ;;  %v881_v15 = vand.u32 15, %v5159_v2  ;;  %v869_v13 = vadd.s32 96, %v5159_v2 }
 0x24c   : > { %v1290_v31 = vsel %vm6159_vm3, %v6309_v43, %v1286_v17  ;;  %v6316_v20 = vrot.slane %v5232_v46, 7  ;;  %v5695_v51 = vsel %vm6317_vm9, %v1155_v30, %v1156_v27  ;;  %vm6318_vm3 = vcmp.lt.s32.totalorder %v5159_v2, 7  ;;  %3573 = vmatpush3.bf16.msra.mxu1 %v4176_v47 }
 0x24d   : > { %v5674_v48 = vsel %vm6295_vm5, %v6312_v59, %v1155_v30  ;;  %v5676_v12 = vpack.c.bf16 %v1290_v31, %v1291_v45  ;;  %vm5683_vm11 = vcmp.ne.s32.totalorder %v6313_v11, 0  ;;  %v5699_v39 = vsel %vm6318_vm3, %v1286_v17, %v1287_v25  ;;  %vm6320_vm13 = vmmov %vm6318_vm3  ;;  %3491 = vmatpush3.bf16.msra.mxu0 %v4155_v22  ;;  %v4172_v22 = vld [vmem:[#allocation10 + $0x90] sm:$0xff]   ;;  %v4177_v11 = vld [vmem:[#allocation10 + $0x98] sm:$0xff]  }
 0x24e   : > { %v1177_v45 = vsel %vm6295_vm5, %v1156_v27, %v6316_v20  ;;  %v6319_v43 = vrot.slane %v5232_v46, 1  ;;  %v3285_v30 = vpack.c.bf16 %v5695_v51, %v5674_v48  ;;  %vm6321_vm3 = vmpackc.low %vm5185_vm1, %vm5185_vm1  ;;  %vm6322_vm9 = vmmov 1   ;;  %3492 = vmatprep.subr.bf16.mxu0 %v4158_v28  ;;  %v4181_v20 = vld [vmem:[#allocation10 + $0xb8] sm:$0xff]  }
 0x24f   : > { %v3166_v59 = vpack.c.bf16 %v5269_v7, %v1177_v45  ;;  %3755 = vmatmul.mubr.msk.bf16.gmra.mrb[32].mxu0 %vm5666_vm8, %v5676_v12  ;;  %v4159_v7 = vld [vmem:[#allocation10 + $0x38] sm:$0xff]   ;;  %vm3344_vm5 = vcmp.ne.s32.totalorder %v881_v15, 0  ;;  %v965_v10 = vand.u32 15, %v869_v13  ;;  %v4178_v15 = vld [vmem:[#allocation10 + $0xa0] sm:$0xff]   ;;  %v4180_v13 = vld [vmem:[#allocation10 + $0xb0] sm:$0xff]  }
 0x250   : > { %v5705_v31 = vsel %vm6320_vm13, %v1287_v25, %v6319_v43  ;;  %3163 = vmatprep.mubr.msk.bf16.mxu0 %vm6321_vm3, %v5250_v57  ;;  %vm5724_vm13 = vmpackc.low %vm6322_vm9, %vm5683_vm11  ;;  %v871_v57 = vadd.s32 112, %v5159_v2  ;;  %v4182_v45 = vld [vmem:[#allocation10 + $0x200] sm:$0xff]   ;;  %v4197_v48 = vld [vmem:[#allocation11 + $0x38] sm:$0xff]  }
 0x251   : > { %v3317_v17 = vpack.c.bf16 %v5705_v31, %v5699_v39  ;;  %3092 = vmatmul.mubr.msk.bf16.gmra.mrb[20].mxu1 %vm5724_vm13, %v5527_v58  ;;  %3493 = vmatpush3.bf16.msra.mxu0 %v4159_v7  ;;  %vm3165_vm1 = vmpackc.low %vm6322_vm9, %vm3344_vm5  ;;  %vm3353_vm11 = vcmp.ne.s32.totalorder %v965_v10, 0 }
 0x252   : > { %1692 = vmatprep.mubr.bf16.mxu1 %v5531_v40  ;;  %3758 = vmatprep.subr.bf16.mxu0 %v4162_v3  ;;  %vm5736_vm3 = vmpackc.low %vm6322_vm9, %vm3353_vm11  ;;  %v979_v25 = vand.u32 15, %v871_v57 }
 0x254   : > { %vm3354_vm5 = vcmp.ne.s32.totalorder %v979_v25, 0 }
 0x257   : > { %3167 = vmatmul.mubr.msk.bf16.vlgmr.msra.gmra.mrb[36].mxu0 %vm3165_vm1, %v3166_v59  ;;  %vm5750_vm1 = vmpackc.low %vm6322_vm9, %vm3354_vm5  ;;  %vm6336_vm5 = vnez %v6297_v63 }
 0x258   : > { %1998 = vmatprep.mubr.bf16.mxu0 %v5281_v29  ;;  %3759 = vmatpush3.bf16.msra.mxu0 %v4162_v3  ;;  %v873_v29 = vadd.s32 128, %v5159_v2 }
 0x259   : > { %3760 = vmatprep.subr.bf16.mxu0 %v4167_v14  ;;  %3096 = vmatmul.mubr.msk.bf16.gmra.mrb[24].mxu1 %vm5736_vm3, %v5555_v54 }
 0x25a   : > { %1700 = vmatprep.mubr.bf16.mxu1 %v5573_v53  ;;  %v993_v28 = vand.u32 15, %v873_v29 }
 0x25c   : > { %3761 = vmatpush3.bf16.msra.mxu0 %v4167_v14  ;;  %vm3355_vm11 = vcmp.ne.s32.totalorder %v993_v28, 0 }
 0x25d   : > { %3762 = vmatprep.subr.bf16.mxu0 %v4172_v22 }
 0x25f   : > { %3171 = vmatmul.mubr.msk.bf16.gmra.mrb[40].mxu0 %vm5296_vm10, %v5300_v42  ;;  %vm5763_vm10 = vmpackc.low %vm6322_vm9, %vm3355_vm11 }
 0x260   : > { %2006 = vmatprep.mubr.bf16.mxu0 %v5284_v18  ;;  %3763 = vmatpush3.bf16.msra.mxu0 %v4172_v22 }
 0x261   : > { %3764 = vmatprep.subr.bf16.mxu0 %v4177_v11  ;;  %3100 = vmatmul.mubr.msk.bf16.gmra.mrb[28].mxu1 %vm5750_vm1, %v5609_v26 }
 0x262   : > { %1708 = vmatprep.mubr.bf16.mxu1 %v5559_v36 }
 0x264   : > { %3765 = vmatpush3.bf16.msra.mxu0 %v4177_v11 }
 0x265   : > { %3766 = vmatprep.subr.bf16.mxu0 %v4178_v15 }
 0x267   : > { %3175 = vmatmul.mubr.msk.bf16.gmra.mrb[44].mxu0 %vm5405_vm4, %v5374_v21 }
 0x268   : > { %2014 = vmatprep.mubr.bf16.mxu0 %v5378_v50  ;;  %3767 = vmatpush3.bf16.msra.mxu0 %v4178_v15 }
 0x269   : > { %3768 = vmatprep.subr.bf16.mxu0 %v4179_v41  ;;  %3104 = vmatmul.mubr.msk.bf16.gmra.mrb[32].mxu1 %vm5763_vm10, %v5647_v24 }
 0x26a   : > { %2377 = vmatprep.mubr.bf16.mxu1 %v5284_v18 }
 0x26c   : > { %3769 = vmatpush3.bf16.msra.mxu0 %v4179_v41 }
 0x26d   : > { %3770 = vmatprep.subr.bf16.mxu0 %v4180_v13 }
 0x26f   : > { %3179 = vmatmul.mubr.msk.bf16.gmra.mrb[48].mxu0 %vm5523_vm0, %v5417_v16 }
 0x270   : > { %2022 = vmatprep.mubr.bf16.mxu0 %v5432_v49  ;;  %3771 = vmatpush3.bf16.msra.mxu0 %v4180_v13 }
 0x271   : > { %3772 = vmatprep.subr.bf16.mxu0 %v4181_v20  ;;  %3255 = vmatmul.mubr.msk.bf16.vlgmr.msra.gmra.mrb[36].mxu1 %vm5405_vm4, %v5374_v21  ;;  %v4183_v21 = vld [vmem:[#allocation10 + $0x208] sm:$0xff]  }
 0x272   : > { %2385 = vmatprep.mubr.bf16.mxu1 %v5378_v50  ;;  %v858_v50 = vadd.s32 8, %v5159_v2 }
 0x274   : > { %3773 = vmatpush3.bf16.msra.mxu0 %v4181_v20  ;;  %v888_v18 = vand.u32 15, %v858_v50 }
 0x275   : > { %3790 = vmatprep.subr.bf16.mxu0 %v4182_v45 }
 0x276   : > { %vm3345_vm4 = vcmp.ne.s32.totalorder %v888_v18, 15 }
 0x277   : > { %3183 = vmatmul.mubr.msk.bf16.gmra.mrb[52].mxu0 %vm5614_vm6, %v5469_v60 }
 0x278   : > { %2030 = vmatprep.mubr.bf16.mxu0 %v5485_v8 }
 0x279   : > { %3259 = vmatmul.mubr.msk.bf16.gmra.mrb[40].mxu1 %vm5523_vm0, %v5417_v16  ;;  %vm3197_vm0 = vmpackc.low %vm3345_vm4, %vm6322_vm9  ;;  %v875_v16 = vadd.s32 144, %v5159_v2  ;;  %v4191_v2 = vld [vmem:[#allocation11 + $0x8] sm:$0xff]  }
 0x27a   : > { %2393 = vmatprep.mubr.bf16.mxu1 %v5432_v49 }
 0x27b   : > { %v1007_v49 = vand.u32 15, %v875_v16 }
 0x27f   : > { %3187 = vmatmul.mubr.msk.bf16.gmra.mrb[56].mxu0 %vm5724_vm13, %v5527_v58 }
 0x280   : > { %2038 = vmatprep.mubr.bf16.mxu0 %v5531_v40 }
 0x281   : > { %3263 = vmatmul.mubr.msk.bf16.gmra.mrb[44].mxu1 %vm5614_vm6, %v5469_v60  ;;  %vm3280_vm6 = vmpackc.low %vm5501_vm2, %vm5501_vm2  ;;  %v4187_v60 = vld [vmem:[#allocation10 + $0x228] sm:$0xff]  }
 0x282   : > { %2401 = vmatprep.mubr.bf16.mxu1 %v5485_v8  ;;  %v6333_v8 = vld [vmem:[#allocation38_spill] sm:$0xff] }
 0x287   : > { %3191 = vmatmul.mubr.msk.bf16.gmra.mrb[60].mxu0 %vm5736_vm3, %v5555_v54 }
 0x288   : > { %2046 = vmatprep.mubr.bf16.mxu0 %v5573_v53 }
 0x289   : > { %3267 = vmatmul.mubr.msk.bf16.gmra.mrb[48].mxu1 %vm5724_vm13, %v5527_v58  ;;  %vm3346_vm13 = vcmp.ne.s32.totalorder %v1007_v49, 0  ;;  %v4189_v58 = vld [vmem:[#allocation10 + $0x238] sm:$0xff]  }
 0x28a   : > { %2409 = vmatprep.mubr.bf16.mxu1 %v5531_v40  ;;  %vm3284_vm2 = vmpackc.low %vm6322_vm9, %vm3346_vm13  ;;  %v4194_v40 = vld [vmem:[#allocation11 + $0x20] sm:$0xff]  }
 0x28f   : > { %3195 = vmatmul.mubr.msk.bf16.gmra.mrb[64].mxu0 %vm5750_vm1, %v5609_v26 }
 0x290   : > { %3774 = vmatprep.mubr.msk.bf16.mxu0 %vm3197_vm0, %v3198_v56 }
 0x291   : > { %3271 = vmatmul.mubr.msk.bf16.gmra.mrb[52].mxu1 %vm5736_vm3, %v5555_v54  ;;  %v4185_v54 = vld [vmem:[#allocation10 + $0x218] sm:$0xff]   ;;  %vm6335_vm3 = vnez %v6334_v35 }
 0x292   : > { %2417 = vmatprep.mubr.bf16.mxu1 %v5573_v53 }
 0x297   : > { %3775 = vmatmul.mubr.msk.bf16.vlgmr.msra.gmra.mrb[20].mxu0 %vm5324_vm12, %v5335_v19  ;;  %vm6331_vm12 = vnez %v6268_v9  ;;  %v4186_v19 = vld [vmem:[#allocation10 + $0x220] sm:$0xff]  }
 0x298   : > { %3778 = vmatprep.mubr.msk.bf16.mxu0 %vm5349_vm14, %v5359_v34  ;;  %3791 = vmatpush3.bf16.msra.mxu0 %v4182_v45  ;;  %v4190_v9 = vld [vmem:[#allocation11] sm:$0xff]  }
 0x299   : > { %3792 = vmatprep.subr.bf16.mxu0 %v4183_v21  ;;  %3275 = vmatmul.mubr.msk.bf16.gmra.mrb[56].mxu1 %vm5750_vm1, %v5609_v26 }
 0x29a   : > { %2425 = vmatprep.mubr.bf16.mxu1 %v5559_v36  ;;  %3822 = vmatprep.subr.bf16.mxu1 %v4190_v9  ;;  %v4196_v36 = vld [vmem:[#allocation11 + $0x30] sm:$0xff]  }
 0x29b   : > { %3823 = vmatpush3.bf16.msra.mxu1 %v4190_v9 }
 0x29c   : > { %3793 = vmatpush3.bf16.msra.mxu0 %v4183_v21  ;;  %3824 = vmatprep.subr.bf16.mxu1 %v4191_v2 }
 0x29d   : > { %3794 = vmatprep.subr.bf16.mxu0 %v4184_v38 }
 0x29f   : > { %3779 = vmatmul.mubr.msk.bf16.gmra.mrb[24].mxu0 %vm6331_vm12, %v5409_v61  ;;  %3825 = vmatpush3.bf16.msra.mxu1 %v4191_v2 }
 0x2a0   : > { %3782 = vmatprep.mubr.msk.bf16.mxu0 %vm5465_vm7, %v5472_v0  ;;  %3795 = vmatpush3.bf16.msra.mxu0 %v4184_v38 }
 0x2a1   : > { %3796 = vmatprep.subr.bf16.mxu0 %v4185_v54  ;;  %3279 = vmatmul.mubr.msk.bf16.gmra.mrb[60].mxu1 %vm5763_vm10, %v5647_v24 }
 0x2a2   : > { %3282 = vmatprep.mubr.msk.bf16.mxu1 %vm3280_vm6, %v5653_v32 }
 0x2a4   : > { %3797 = vmatpush3.bf16.msra.mxu0 %v4185_v54 }
 0x2a5   : > { %3798 = vmatprep.subr.bf16.mxu0 %v4186_v19 }
 0x2a7   : > { %3783 = vmatmul.mubr.msk.bf16.gmra.mrb[28].mxu0 %vm6335_vm3, %v6333_v8 }
 0x2a8   : > { %3786 = vmatprep.mubr.msk.bf16.mxu0 %vm5569_vm15, %v5576_v44  ;;  %3799 = vmatpush3.bf16.msra.mxu0 %v4186_v19 }
 0x2a9   : > { %3800 = vmatprep.subr.bf16.mxu0 %v4187_v60  ;;  %3286 = vmatmul.mubr.msk.bf16.gmra.mrb[64].mxu1 %vm3284_vm2, %v3285_v30 }
 0x2ac   : > { %3801 = vmatpush3.bf16.msra.mxu0 %v4187_v60 }
 0x2ad   : > { %3802 = vmatprep.subr.bf16.mxu0 %v4188_v52 }
 0x2af   : > { %3787 = vmatmul.mubr.msk.bf16.gmra.mrb[32].mxu0 %vm6336_vm5, %v5607_v55 }
 0x2b0   : > { %3803 = vmatpush3.bf16.msra.mxu0 %v4188_v52  ;;  %3806 = vmatprep.mubr.msk.bf16.mxu0 %vm5349_vm14, %v5359_v34  ;;  %v1014_v34 = vand.u32 15, %v876_v23 }
 0x2b1   : > { %3804 = vmatprep.subr.bf16.mxu0 %v4189_v58 }
 0x2b2   : > { %vm3347_vm14 = vcmp.ne.s32.totalorder %v1014_v34, 15 }
 0x2b4   : > { %3805 = vmatpush3.bf16.msra.mxu0 %v4189_v58 }
 0x2b7   : > { %3807 = vmatmul.mubr.msk.bf16.vlgmr.msra.gmra.mrb[20].mxu0 %vm6331_vm12, %v5409_v61  ;;  %v4192_v61 = vld [vmem:[#allocation11 + $0x10] sm:$0xff]  }
 0x2b8   : > { %3810 = vmatprep.mubr.msk.bf16.mxu0 %vm5465_vm7, %v5472_v0  ;;  %vm3316_vm7 = vmpackc.low %vm3347_vm14, %vm6322_vm9  ;;  %3826 = vmatprep.subr.bf16.mxu1 %v4192_v61  ;;  %v4193_v0 = vld [vmem:[#allocation11 + $0x18] sm:$0xff]  }
 0x2b9   : > { %3827 = vmatpush3.bf16.msra.mxu1 %v4192_v61 }
 0x2ba   : > { %3828 = vmatprep.subr.bf16.mxu1 %v4193_v0 }
 0x2bd   : > { %3829 = vmatpush3.bf16.msra.mxu1 %v4193_v0 }
 0x2be   : > { %3830 = vmatprep.subr.bf16.mxu1 %v4194_v40 }
 0x2bf   : > { %3811 = vmatmul.mubr.msk.bf16.gmra.mrb[24].mxu0 %vm6335_vm3, %v6333_v8 }
 0x2c0   : > { %3814 = vmatprep.mubr.msk.bf16.mxu0 %vm5569_vm15, %v5576_v44  ;;  %v4195_v44 = vld [vmem:[#allocation11 + $0x28] sm:$0xff]  }
 0x2c1   : > { %3831 = vmatpush3.bf16.msra.mxu1 %v4194_v40 }
 0x2c2   : > { %3832 = vmatprep.subr.bf16.mxu1 %v4195_v44 }
 0x2c5   : > { %3833 = vmatpush3.bf16.msra.mxu1 %v4195_v44 }
 0x2c6   : > { %3834 = vmatprep.subr.bf16.mxu1 %v4196_v36 }
 0x2c7   : > { %3815 = vmatmul.mubr.msk.bf16.gmra.mrb[28].mxu0 %vm6336_vm5, %v5607_v55 }
 0x2c8   : > { %3818 = vmatprep.mubr.msk.bf16.mxu0 %vm5666_vm8, %v5676_v12 }
 0x2c9   : > { %3835 = vmatpush3.bf16.msra.mxu1 %v4196_v36 }
 0x2ca   : > { %3836 = vmatprep.subr.bf16.mxu1 %v4197_v48 }
 0x2cd   : > { %3837 = vmatpush3.bf16.msra.mxu1 %v4197_v48 }
 0x2cf   : > { %3819 = vmatmul.mubr.msk.bf16.gmra.mrb[32].mxu0 %vm3316_vm7, %v3317_v17 }
 0x301   : > { %v3414_v5 = vpop.f32.mrb[4].mxu1 }
 0x302   : > { %v3415_v53 = vpop.f32.mrb[5].mxu1 }
 0x303   : > { %v3416_v63 = vadd.f32 %v3415_v53, %v3414_v5  ;;  %v3417_v55 = vpop.f32.mrb[6].mxu1 }
 0x304   : > { %v3418_v26 = vpop.f32.mrb[7].mxu1 }
 0x305   : > { %v3419_v62 = vadd.f32 %v3418_v26, %v3417_v55 }
 0x30a   : > { %v3420_v6 = vpop.f32.mrb[8].mxu1 }
 0x30b   : > { %v3421_v33 = vpop.f32.mrb[9].mxu1 }
 0x30c   : > { %v3422_v24 = vadd.f32 %v3421_v33, %v3420_v6  ;;  %v3423_v56 = vpop.f32.mrb[10].mxu1 }
 0x30d   : > { %v3424_v32 = vpop.f32.mrb[11].mxu1 }
 0x30e   : > { %v3425_v1 = vadd.f32 %v3424_v32, %v3423_v56 }
 0x312   : > { %v3426_v12 = vpop.f32.mrb[12].mxu1 }
 0x313   : > { %v3427_v47 = vpop.f32.mrb[13].mxu1 }
 0x314   : > { %v3428_v51 = vadd.f32 %v3427_v47, %v3426_v12  ;;  %v3429_v39 = vpop.f32.mrb[14].mxu1 }
 0x315   : > { %v3430_v43 = vpop.f32.mrb[15].mxu1 }
 0x316   : > { %v3431_v31 = vadd.f32 %v3430_v43, %v3429_v39 }
 0x31a   : > { %v3432_v59 = vpop.f32.mrb[16].mxu1 }
 0x31b   : > { %v3433_v30 = vpop.f32.mrb[17].mxu1 }
 0x31c   : > { %v3434_v17 = vadd.f32 %v3433_v30, %v3432_v59  ;;  %v3435_v46 = vpop.f32.mrb[18].mxu1 }
 0x31d   : > { %v3436_v7 = vpop.f32.mrb[19].mxu1 }
 0x31e   : > { %v3437_v3 = vadd.f32 %v3436_v7, %v3435_v46 }
 0x324   : > { %v3438_v10 = vpop.f32.mrb[20].mxu1 }
 0x325   : > { %v3439_v14 = vpop.f32.mrb[21].mxu1 }
 0x326   : > { %v5878_v57 = vadd.f32 %v3439_v14, %v3438_v10  ;;  %v3441_v27 = vpop.f32.mrb[22].mxu1 }
 0x327   : > { %v3442_v25 = vpop.f32.mrb[23].mxu1 }
 0x328   : > { %v5880_v22 = vadd.f32 %v3442_v25, %v3441_v27 }
 0x32a   : > { %v3494_v29 = vpop.f32.mrb[36].mxu0 }
 0x32b   : > { %v3495_v11 = vpop.f32.mrb[37].mxu0 }
 0x32c   : > { %v3496_v37 = vadd.f32 %v3495_v11, %v3494_v29  ;;  %v3497_v28 = vpop.f32.mrb[38].mxu0  ;;  %v3444_v42 = vpop.f32.mrb[24].mxu1 }
 0x32d   : > { %v3498_v15 = vpop.f32.mrb[39].mxu0  ;;  %v3445_v20 = vpop.f32.mrb[25].mxu1 }
 0x32e   : > { %v3857_v41 = vadd.f32 %v3496_v37, %v3416_v63  ;;  %v3499_v13 = vadd.f32 %v3498_v15, %v3497_v28  ;;  %v5882_v45 = vadd.f32 %v3445_v20, %v3444_v42  ;;  %v3447_v18 = vpop.f32.mrb[26].mxu1 }
 0x32f   : > { %v3448_v21 = vpop.f32.mrb[27].mxu1 }
 0x330   : > { %v3863_v50 = vadd.f32 %v3499_v13, %v3419_v62  ;;  %v5884_v38 = vadd.f32 %v3448_v21, %v3447_v18 }
 0x332   : > { %v3500_v54 = vpop.f32.mrb[40].mxu0 }
 0x333   : > { %v3501_v16 = vpop.f32.mrb[41].mxu0 }
 0x334   : > { %v3502_v4 = vadd.f32 %v3501_v16, %v3500_v54  ;;  %v3503_v19 = vpop.f32.mrb[42].mxu0  ;;  %v3450_v8 = vpop.f32.mrb[28].mxu1 }
 0x335   : > { %v3504_v49 = vpop.f32.mrb[43].mxu0  ;;  %v3451_v52 = vpop.f32.mrb[29].mxu1 }
 0x336   : > { %v3854_v60 = vadd.f32 %v3502_v4, %v3422_v24  ;;  %v3505_v35 = vadd.f32 %v3504_v49, %v3503_v19  ;;  %v5886_v58 = vadd.f32 %v3451_v52, %v3450_v8  ;;  %v3453_v34 = vpop.f32.mrb[30].mxu1 }
 0x337   : > { %v3454_v9 = vpop.f32.mrb[31].mxu1 }
 0x338   : > { %v3860_v23 = vadd.f32 %v3505_v35, %v3425_v1  ;;  %v5888_v2 = vadd.f32 %v3454_v9, %v3453_v34 }
 0x33a   : > { %v3506_v61 = vpop.f32.mrb[44].mxu0 }
 0x33b   : > { %v3507_v0 = vpop.f32.mrb[45].mxu0 }
 0x33c   : > { %v3508_v40 = vadd.f32 %v3507_v0, %v3506_v61  ;;  %v3509_v44 = vpop.f32.mrb[46].mxu0  ;;  %v3456_v53 = vpop.f32.mrb[32].mxu1 }
 0x33d   : > { %v3510_v36 = vpop.f32.mrb[47].mxu0  ;;  %v3457_v55 = vpop.f32.mrb[33].mxu1 }
 0x33e   : > { %v3869_v5 = vadd.f32 %v3508_v40, %v3428_v51  ;;  %v3511_v63 = vadd.f32 %v3510_v36, %v3509_v44  ;;  %v5890_v26 = vadd.f32 %v3457_v55, %v3456_v53  ;;  %v3459_v6 = vpop.f32.mrb[34].mxu1 }
 0x33f   : > { %v3460_v33 = vpop.f32.mrb[35].mxu1 }
 0x340   : > { %v3875_v62 = vadd.f32 %v3511_v63, %v3431_v31  ;;  %v5892_v24 = vadd.f32 %v3460_v33, %v3459_v6 }
 0x342   : > { %v3512_v56 = vpop.f32.mrb[48].mxu0 }
 0x343   : > { %v3513_v32 = vpop.f32.mrb[49].mxu0 }
 0x344   : > { %v3514_v1 = vadd.f32 %v3513_v32, %v3512_v56  ;;  %v3515_v48 = vpop.f32.mrb[50].mxu0  ;;  %v3574_v39 = vpop.f32.mrb[36].mxu1 }
 0x345   : > { %v3516_v12 = vpop.f32.mrb[51].mxu0  ;;  %v3575_v59 = vpop.f32.mrb[37].mxu1 }
 0x346   : > { %v3866_v47 = vadd.f32 %v3514_v1, %v3434_v17  ;;  %v3517_v43 = vadd.f32 %v3516_v12, %v3515_v48  ;;  %v3576_v30 = vadd.f32 %v3575_v59, %v3574_v39  ;;  %v3577_v46 = vpop.f32.mrb[38].mxu1 }
 0x347   : > { %v3578_v7 = vpop.f32.mrb[39].mxu1 }
 0x348   : > { %v3872_v51 = vadd.f32 %v3517_v43, %v3437_v3  ;;  %v3579_v10 = vadd.f32 %v3578_v7, %v3577_v46  ;;  %v5894_v31 = vadd.f32 %v3857_v41, %v3576_v30 }
 0x34a   : > { %v3518_v14 = vpop.f32.mrb[52].mxu0  ;;  %v5896_v11 = vadd.f32 %v3863_v50, %v3579_v10 }
 0x34b   : > { %v3519_v27 = vpop.f32.mrb[53].mxu0 }
 0x34c   : > { %v3520_v25 = vadd.f32 %v3519_v27, %v3518_v14  ;;  %v3521_v29 = vpop.f32.mrb[54].mxu0  ;;  %v3580_v17 = vpop.f32.mrb[40].mxu1 }
 0x34d   : > { %v3522_v37 = vpop.f32.mrb[55].mxu0  ;;  %v3581_v42 = vpop.f32.mrb[41].mxu1 }
 0x34e   : > { %v3881_v28 = vadd.f32 %v3520_v25, %v5878_v57  ;;  %v3523_v15 = vadd.f32 %v3522_v37, %v3521_v29  ;;  %v3582_v13 = vadd.f32 %v3581_v42, %v3580_v17  ;;  %v3583_v20 = vpop.f32.mrb[42].mxu1 }
 0x34f   : > { %v3584_v18 = vpop.f32.mrb[43].mxu1 }
 0x350   : > { %v3887_v3 = vadd.f32 %v3523_v15, %v5880_v22  ;;  %v3585_v21 = vadd.f32 %v3584_v18, %v3583_v20  ;;  %v5900_v41 = vadd.f32 %v3854_v60, %v3582_v13 }
 0x352   : > { %v3524_v54 = vpop.f32.mrb[56].mxu0  ;;  %v5902_v50 = vadd.f32 %v3860_v23, %v3585_v21 }
 0x353   : > { %v3525_v16 = vpop.f32.mrb[57].mxu0 }
 0x354   : > { %v3526_v4 = vadd.f32 %v3525_v16, %v3524_v54  ;;  %v3527_v19 = vpop.f32.mrb[58].mxu0  ;;  %v3586_v8 = vpop.f32.mrb[44].mxu1 }
 0x355   : > { %v3528_v49 = vpop.f32.mrb[59].mxu0  ;;  %v3587_v52 = vpop.f32.mrb[45].mxu1 }
 0x356   : > { %v3878_v57 = vadd.f32 %v3526_v4, %v5882_v45  ;;  %v3529_v35 = vadd.f32 %v3528_v49, %v3527_v19  ;;  %v3588_v34 = vadd.f32 %v3587_v52, %v3586_v8  ;;  %v3589_v9 = vpop.f32.mrb[46].mxu1 }
 0x357   : > { %v3590_v61 = vpop.f32.mrb[47].mxu1 }
 0x358   : > { %v3884_v22 = vadd.f32 %v3529_v35, %v5884_v38  ;;  %v3591_v0 = vadd.f32 %v3590_v61, %v3589_v9  ;;  %v5906_v60 = vadd.f32 %v3869_v5, %v3588_v34 }
 0x35a   : > { %v3530_v40 = vpop.f32.mrb[60].mxu0  ;;  %v5908_v23 = vadd.f32 %v3875_v62, %v3591_v0 }
 0x35b   : > { %v3531_v44 = vpop.f32.mrb[61].mxu0 }
 0x35c   : > { %v3532_v36 = vadd.f32 %v3531_v44, %v3530_v40  ;;  %v3533_v53 = vpop.f32.mrb[62].mxu0  ;;  %v3592_v55 = vpop.f32.mrb[48].mxu1 }
 0x35d   : > { %v3534_v63 = vpop.f32.mrb[63].mxu0  ;;  %v3593_v33 = vpop.f32.mrb[49].mxu1 }
 0x35e   : > { %v3893_v45 = vadd.f32 %v3532_v36, %v5886_v58  ;;  %v3535_v6 = vadd.f32 %v3534_v63, %v3533_v53  ;;  %v3594_v56 = vadd.f32 %v3593_v33, %v3592_v55  ;;  %v3595_v32 = vpop.f32.mrb[50].mxu1 }
 0x35f   : > { %v3596_v1 = vpop.f32.mrb[51].mxu1 }
 0x360   : > { %v3899_v38 = vadd.f32 %v3535_v6, %v5888_v2  ;;  %v3597_v48 = vadd.f32 %v3596_v1, %v3595_v32  ;;  %v3867_v5 = vadd.f32 %v3866_v47, %v3594_v56 }
 0x362   : > { %v3536_v12 = vpop.f32.mrb[64].mxu0  ;;  %v3873_v30 = vadd.f32 %v3872_v51, %v3597_v48 }
 0x363   : > { %v3537_v39 = vpop.f32.mrb[65].mxu0 }
 0x364   : > { %v3538_v43 = vadd.f32 %v3537_v39, %v3536_v12  ;;  %v3539_v59 = vpop.f32.mrb[66].mxu0  ;;  %v3598_v7 = vpop.f32.mrb[52].mxu1 }
 0x365   : > { %v3540_v62 = vpop.f32.mrb[67].mxu0  ;;  %v3599_v10 = vpop.f32.mrb[53].mxu1 }
 0x366   : > { %v3890_v46 = vadd.f32 %v3538_v43, %v5890_v26  ;;  %v3541_v58 = vadd.f32 %v3540_v62, %v3539_v59  ;;  %v3600_v27 = vadd.f32 %v3599_v10, %v3598_v7  ;;  %v3601_v2 = vpop.f32.mrb[54].mxu1 }
 0x367   : > { %v3602_v25 = vpop.f32.mrb[55].mxu1 }
 0x368   : > { %v3896_v14 = vadd.f32 %v3541_v58, %v5892_v24  ;;  %v3603_v29 = vadd.f32 %v3602_v25, %v3601_v2  ;;  %v5914_v37 = vadd.f32 %v3881_v28, %v3600_v27 }
 0x36a   : > { %v5916_v17 = vadd.f32 %v3887_v3, %v3603_v29 }
 0x36c   : > { %v3604_v47 = vpop.f32.mrb[56].mxu1 }
 0x36d   : > { %v3605_v15 = vpop.f32.mrb[57].mxu1 }
 0x36e   : > { %v3606_v42 = vadd.f32 %v3605_v15, %v3604_v47  ;;  %v3607_v51 = vpop.f32.mrb[58].mxu1 }
 0x36f   : > { %v3608_v13 = vpop.f32.mrb[59].mxu1 }
 0x370   : > { %v3609_v20 = vadd.f32 %v3608_v13, %v3607_v51  ;;  %v3879_v26 = vadd.f32 %v3878_v57, %v3606_v42 }
 0x372   : > { %v3885_v18 = vadd.f32 %v3884_v22, %v3609_v20  ;;  %v5927_v22 = vld [vmem:[%s6337_s0] ss:$0 sm:$0xff] }
 0x374   : > { %v3610_v21 = vpop.f32.mrb[60].mxu1 }
 0x375   : > { %v3611_v54 = vpop.f32.mrb[61].mxu1 }
 0x376   : > { %v3612_v16 = vadd.f32 %v3611_v54, %v3610_v21  ;;  %v3613_v24 = vpop.f32.mrb[62].mxu1 }
 0x377   : > { %v3614_v4 = vpop.f32.mrb[63].mxu1 }
 0x378   : > { %v3615_v19 = vadd.f32 %v3614_v4, %v3613_v24  ;;  %v5918_v49 = vadd.f32 %v3893_v45, %v3612_v16 }
 0x37a   : > { %v5920_v28 = vadd.f32 %v3899_v38, %v3615_v19 }
 0x37c   : > { %v3616_v3 = vpop.f32.mrb[64].mxu1 }
 0x37d   : > { %v3617_v8 = vpop.f32.mrb[65].mxu1 }
 0x37e   : > { %v3618_v35 = vadd.f32 %v3617_v8, %v3616_v3  ;;  %v3619_v52 = vpop.f32.mrb[66].mxu1 }
 0x37f   : > { %v3620_v34 = vpop.f32.mrb[67].mxu1 }
 0x380   : > { %v3621_v9 = vadd.f32 %v3620_v34, %v3619_v52  ;;  %v3891_v61 = vadd.f32 %v3890_v46, %v3618_v35 }
 0x382   : > { %v5922_v0 = vadd.f32 %v3896_v14, %v3621_v9 }
 0x38a   : > { %v3808_v57 = vpop.f32.mrb[20].mxu0 }
 0x38b   : > { %v3856_v40 = vadd.f32 %v5900_v41, %v3808_v57  ;;  %v2476_v44 = vpop.f32.mrb[21].mxu0 }
 0x38c   : > { %v3859_v36 = vadd.f32 %v5894_v31, %v2476_v44  ;;  %v3809_v53 = vpop.f32.mrb[22].mxu0 }
 0x38d   : > { %v2564_v63 = vadd.f32 %v3856_v40, %v5927_v22  ;;  %v3862_v45 = vadd.f32 %v5902_v50, %v3809_v53  ;;  %v2479_v55 = vpop.f32.mrb[23].mxu0 }
 0x38e   : > { %v2562_v6 = vadd.f32 %v3859_v36, %v5927_v22  ;;  %v3865_v33 = vadd.f32 %v5896_v11, %v2479_v55 }
 0x38f   : > { %v2565_v38 = vadd.f32 %v3862_v45, %v5927_v22  ;;  %v2580_v32 = vmax.f32 %v2564_v63, 0.0 }
 0x390   : > { %v2563_v56 = vadd.f32 %v3865_v33, %v5927_v22  ;;  %v2578_v41 = vmax.f32 %v2562_v6, 0.0 }
 0x391   : > { %v2581_v1 = vmax.f32 %v2565_v38, 0.0 }
 0x392   : > { %v2579_v48 = vmax.f32 %v2563_v56, 0.0  ;;  %v3812_v12 = vpop.f32.mrb[24].mxu0 }
 0x393   : > { %v2595_v31 = vpack.c.bf16 %v2581_v1, %v2580_v32  ;;  %v3868_v39 = vadd.f32 %v3867_v5, %v3812_v12  ;;  %v2492_v43 = vpop.f32.mrb[25].mxu0 }
 0x394   : > { %v3871_v59 = vadd.f32 %v5906_v60, %v2492_v43  ;;  %v3813_v50 = vpop.f32.mrb[26].mxu0  ;;  %v2594_v62 = vpack.c.bf16 %v2579_v48, %v2578_v41  ;;  %v4198_v41 = vld [vmem:[%s5035_s5 + $0x10] sm:$0xff] }
 0x395   : > { %v2568_v46 = vadd.f32 %v3868_v39, %v5927_v22  ;;  %v3874_v7 = vadd.f32 %v3873_v30, %v3813_v50  ;;  %v2495_v11 = vpop.f32.mrb[27].mxu0  ;;  %v4199_v39 = vld [vmem:[%s5035_s5] sm:$0xff] }
 0x396   : > { %v2566_v58 = vadd.f32 %v3871_v59, %v5927_v22  ;;  %v3877_v10 = vadd.f32 %v5908_v23, %v2495_v11  ;;  %3838 = vmatprep.mubr.bf16.mxu1 %v2594_v62  ;;  %v4200_v62 = vld [vmem:[%s5035_s5 + $0x18] sm:$0xff]  ;;  %v4201_v11 = vld [vmem:[%s5035_s5 + $0x8] sm:$0xff] }
 0x397   : > { %v2569_v14 = vadd.f32 %v3874_v7, %v5927_v22  ;;  %3839 = vmatmul.mubr.bf16.vlgmr.msra.gmra.mrb[68].mxu1 %v2595_v31  ;;  %v2584_v5 = vmax.f32 %v2568_v46, 0.0 }
 0x398   : > { %v2567_v27 = vadd.f32 %v3877_v10, %v5927_v22  ;;  %v2582_v25 = vmax.f32 %v2566_v58, 0.0 }
 0x399   : > { %v2585_v2 = vmax.f32 %v2569_v14, 0.0 }
 0x39a   : > { %v2583_v60 = vmax.f32 %v2567_v27, 0.0  ;;  %v3816_v29 = vpop.f32.mrb[28].mxu0 }
 0x39b   : > { %v3880_v47 = vadd.f32 %v3879_v26, %v3816_v29  ;;  %v2508_v15 = vpop.f32.mrb[29].mxu0  ;;  %v2597_v42 = vpack.c.bf16 %v2585_v2, %v2584_v5  ;;  %v4202_v29 = vld [vmem:[%s5035_s5 + $0x30] sm:$0xff] }
 0x39c   : > { %v3883_v30 = vadd.f32 %v5914_v37, %v2508_v15  ;;  %v3817_v51 = vpop.f32.mrb[30].mxu0  ;;  %v2596_v13 = vpack.c.bf16 %v2583_v60, %v2582_v25 }
 0x39d   : > { %v2572_v23 = vadd.f32 %v3880_v47, %v5927_v22  ;;  %v3886_v20 = vadd.f32 %v3885_v18, %v3817_v51  ;;  %v2511_v21 = vpop.f32.mrb[31].mxu0 }
 0x39e   : > { %v2570_v54 = vadd.f32 %v3883_v30, %v5927_v22  ;;  %v3889_v16 = vadd.f32 %v5916_v17, %v2511_v21  ;;  %3842 = vmatprep.mubr.bf16.mxu1 %v2596_v13  ;;  %v4203_v30 = vld [vmem:[%s5035_s5 + $0x20] sm:$0xff] }
 0x39f   : > { %v2573_v24 = vadd.f32 %v3886_v20, %v5927_v22  ;;  %3843 = vmatmul.mubr.bf16.gmra.mrb[72].mxu1 %v2597_v42  ;;  %v2588_v4 = vmax.f32 %v2572_v23, 0.0  ;;  %v4204_v20 = vld [vmem:[%s5035_s5 + $0x38] sm:$0xff] }
 0x3a0   : > { %v2571_v26 = vadd.f32 %v3889_v16, %v5927_v22  ;;  %v2586_v3 = vmax.f32 %v2570_v54, 0.0  ;;  %v4205_v16 = vld [vmem:[%s5035_s5 + $0x28] sm:$0xff] }
 0x3a1   : > { %v2589_v19 = vmax.f32 %v2573_v24, 0.0 }
 0x3a2   : > { %v2587_v37 = vmax.f32 %v2571_v26, 0.0  ;;  %v3820_v8 = vpop.f32.mrb[32].mxu0 }
 0x3a3   : > { %v3892_v35 = vadd.f32 %v3891_v61, %v3820_v8  ;;  %v2524_v52 = vpop.f32.mrb[33].mxu0  ;;  %v2599_v34 = vpack.c.bf16 %v2589_v19, %v2588_v4 }
 0x3a4   : > { %v3895_v18 = vadd.f32 %v5918_v49, %v2524_v52  ;;  %v3821_v9 = vpop.f32.mrb[34].mxu0  ;;  %v2598_v57 = vpack.c.bf16 %v2587_v37, %v2586_v3  ;;  %v4206_v52 = vld [vmem:[%s5035_s5 + $0x50] sm:$0xff] }
 0x3a5   : > { %v2576_v17 = vadd.f32 %v3892_v35, %v5927_v22  ;;  %v3898_v40 = vadd.f32 %v5922_v0, %v3821_v9  ;;  %v2527_v44 = vpop.f32.mrb[35].mxu0 }
 0x3a6   : > { %v2574_v36 = vadd.f32 %v3895_v18, %v5927_v22  ;;  %v3901_v53 = vadd.f32 %v5920_v28, %v2527_v44  ;;  %3846 = vmatprep.mubr.bf16.mxu1 %v2598_v57  ;;  %v5959_v28 = vld [vmem:[%s6338_s10] ss:$0 sm:$0xff] }
 0x3a7   : > { %v2577_v63 = vadd.f32 %v3898_v40, %v5927_v22  ;;  %3847 = vmatmul.mubr.bf16.gmra.mrb[76].mxu1 %v2599_v34  ;;  %v2592_v45 = vmax.f32 %v2576_v17, 0.0  ;;  %v4207_v57 = vld [vmem:[%s5035_s5 + $0x40] sm:$0xff] }
 0x3a8   : > { %v2575_v61 = vadd.f32 %v3901_v53, %v5927_v22  ;;  %v2590_v55 = vmax.f32 %v2574_v36, 0.0  ;;  %v4208_v36 = vld [vmem:[%s5035_s5 + $0x58] sm:$0xff] }
 0x3a9   : > { %v2593_v49 = vmax.f32 %v2577_v63, 0.0 }
 0x3aa   : > { %v2591_v6 = vmax.f32 %v2575_v61, 0.0  ;;  %v4209_v61 = vld [vmem:[%s5035_s5 + $0x48] sm:$0xff] }
 0x3ab   : > { %v2601_v33 = vpack.c.bf16 %v2593_v49, %v2592_v45 }
 0x3ac   : > { %v2600_v38 = vpack.c.bf16 %v2591_v6, %v2590_v55 }
 0x3ae   : > { %3850 = vmatprep.mubr.bf16.mxu1 %v2600_v38 }
 0x3af   : > { %3851 = vmatmul.mubr.bf16.gmra.mrb[80].mxu1 %v2601_v33 }
 0x46a   : > { %v3840_v0 = vpop.f32.mrb[68].mxu1 }
 0x46b   : > { %v2716_v56 = vadd.f32 %v3840_v0, %v5959_v28  ;;  %v2707_v22 = vpop.f32.mrb[69].mxu1 }
 0x46c   : > { %v2708_v32 = vadd.f32 %v5959_v28, %v2707_v22  ;;  %v3841_v1 = vpop.f32.mrb[70].mxu1  ;;  %v4210_v22 = vld [vmem:[%s5035_s5 + $0x70] sm:$0xff] }
 0x46d   : > { %v2772_v48 = vadd.f32 %v4198_v41, %v2716_v56  ;;  %v2719_v12 = vadd.f32 %v3841_v1, %v5959_v28  ;;  %v2710_v31 = vpop.f32.mrb[71].mxu1 }
 0x46e   : > { %v2770_v43 = vadd.f32 %v4199_v39, %v2708_v32  ;;  %v2711_v59 = vadd.f32 %v5959_v28, %v2710_v31 }
 0x46f   : > { %v2788_v50 = vmax.f32 %v2772_v48, 0.0  ;;  %v2773_v46 = vadd.f32 %v4200_v62, %v2719_v12  ;;  %v4211_v48 = vld [vmem:[%s5035_s5 + $0x60] sm:$0xff]  ;;  %v4213_v62 = vld [vmem:[%s5035_s5 + $0x68] sm:$0xff] }
 0x470   : > { %v2786_v7 = vmax.f32 %v2770_v43, 0.0  ;;  %v2771_v58 = vadd.f32 %v4201_v11, %v2711_v59  ;;  %v4212_v43 = vld [vmem:[%s5035_s5 + $0x78] sm:$0xff]  ;;  %s4565_s5 = smov [#allocation13]  }
 0x471   : > { %2804 = vst [vmem:[%s5971_s4 + $0x10] sm:$0xff] %v2788_v50  ;;  %v2789_v10 = vmax.f32 %v2773_v46, 0.0  ;;  %s4392_s3 = sshll.u32 %s4565_s5, 4  ;;  %s4393_s3 = int_to_ptr.vmem [resolvable:$false] %s4392_s3 }
 0x472   : > { %2802 = vst [vmem:[%s5971_s4] sm:$0xff] %v2786_v7  ;;  %v2787_v14 = vmax.f32 %v2771_v58, 0.0  ;;  %v3844_v27 = vpop.f32.mrb[72].mxu1  ;;  %s4394_s25 = scalar_lea.vmem %s4393_s3, 4096  ;;  %p4395_p9 = scmp.lt.s32.totalorder %s6013_s1, %s4393_s3 }
 0x473   : > { %2805 = vst [vmem:[%s5971_s4 + $0x18] sm:$0xff] %v2789_v10  ;;  %v2732_v5 = vadd.f32 %v3844_v27, %v5959_v28  ;;  %v2723_v2 = vpop.f32.mrb[73].mxu1  ;;  %p4396_p7 = scmp.lt.s32.totalorder %s4394_s25, %s4388_s2 }
 0x474   : > { %2803 = vst [vmem:[%s5971_s4 + $0x8] sm:$0xff] %v2787_v14  ;;  %v2724_v25 = vadd.f32 %v5959_v28, %v2723_v2  ;;  %v3845_v60 = vpop.f32.mrb[74].mxu1 }
 0x475   : > { %v2776_v47 = vadd.f32 %v4202_v29, %v2732_v5  ;;  %v2735_v15 = vadd.f32 %v3845_v60, %v5959_v28  ;;  %v2726_v42 = vpop.f32.mrb[75].mxu1  ;;  %p4397_p6 = por %p4396_p7, %p4395_p9 }
 0x476   : > { %v2774_v51 = vadd.f32 %v4203_v30, %v2724_v25  ;;  %v2727_v13 = vadd.f32 %v5959_v28, %v2726_v42 }
 0x477   : > { %v2792_v23 = vmax.f32 %v2776_v47, 0.0  ;;  %v2777_v21 = vadd.f32 %v4204_v20, %v2735_v15  ;;  %p4398_p13 = pnand %p4397_p6, %p4391_p2 }
 0x478   : > { %v2790_v54 = vmax.f32 %v2774_v51, 0.0  ;;  %v2775_v24 = vadd.f32 %v4205_v16, %v2727_v13 }
 0x479   : > { %2808 = vst [vmem:[%s5971_s4 + $0x30] sm:$0xff] %v2792_v23  ;;  %v2793_v26 = vmax.f32 %v2777_v21, 0.0 }
 0x47a   : > { %2806 = vst [vmem:[%s5971_s4 + $0x20] sm:$0xff] %v2790_v54  ;;  %v2791_v4 = vmax.f32 %v2775_v24, 0.0  ;;  %v3848_v19 = vpop.f32.mrb[76].mxu1 }
 0x47b   : > { %2809 = vst [vmem:[%s5971_s4 + $0x38] sm:$0xff] %v2793_v26  ;;  %v2748_v3 = vadd.f32 %v3848_v19, %v5959_v28  ;;  %v2739_v37 = vpop.f32.mrb[77].mxu1 }
 0x47c   : > { %2807 = vst [vmem:[%s5971_s4 + $0x28] sm:$0xff] %v2791_v4  ;;  %v2740_v8 = vadd.f32 %v5959_v28, %v2739_v37  ;;  %v3849_v35 = vpop.f32.mrb[78].mxu1 }
 0x47d   : > { %v2780_v34 = vadd.f32 %v4206_v52, %v2748_v3  ;;  %v2751_v18 = vadd.f32 %v3849_v35, %v5959_v28  ;;  %v2742_v9 = vpop.f32.mrb[79].mxu1 }
 0x47e   : > { %v2778_v17 = vadd.f32 %v4207_v57, %v2740_v8  ;;  %v2743_v40 = vadd.f32 %v5959_v28, %v2742_v9 }
 0x47f   : > { %v2796_v44 = vmax.f32 %v2780_v34, 0.0  ;;  %v2781_v53 = vadd.f32 %v4208_v36, %v2751_v18 }
 0x480   : > { %v2794_v63 = vmax.f32 %v2778_v17, 0.0  ;;  %v2779_v45 = vadd.f32 %v4209_v61, %v2743_v40 }
 0x481   : > { %2812 = vst [vmem:[%s5971_s4 + $0x50] sm:$0xff] %v2796_v44  ;;  %v2797_v49 = vmax.f32 %v2781_v53, 0.0 }
 0x482   : > { %2810 = vst [vmem:[%s5971_s4 + $0x40] sm:$0xff] %v2794_v63  ;;  %v2795_v55 = vmax.f32 %v2779_v45, 0.0  ;;  %v3852_v6 = vpop.f32.mrb[80].mxu1 }
 0x483   : > { %2813 = vst [vmem:[%s5971_s4 + $0x58] sm:$0xff] %v2797_v49  ;;  %v2764_v33 = vadd.f32 %v3852_v6, %v5959_v28  ;;  %v2755_v38 = vpop.f32.mrb[81].mxu1 }
 0x484   : > { %2811 = vst [vmem:[%s5971_s4 + $0x48] sm:$0xff] %v2795_v55  ;;  %v2756_v0 = vadd.f32 %v5959_v28, %v2755_v38  ;;  %v3853_v56 = vpop.f32.mrb[82].mxu1 }
 0x485   : > { %v2784_v32 = vadd.f32 %v4210_v22, %v2764_v33  ;;  %v2767_v1 = vadd.f32 %v3853_v56, %v5959_v28  ;;  %v2758_v41 = vpop.f32.mrb[83].mxu1 }
 0x486   : > { %v2782_v12 = vadd.f32 %v4211_v48, %v2756_v0  ;;  %v2759_v31 = vadd.f32 %v5959_v28, %v2758_v41 }
 0x487   : > { %v2800_v39 = vmax.f32 %v2784_v32, 0.0  ;;  %v2785_v59 = vadd.f32 %v4212_v43, %v2767_v1 }
 0x488   : > { %v2798_v50 = vmax.f32 %v2782_v12, 0.0  ;;  %v2783_v46 = vadd.f32 %v4213_v62, %v2759_v31 }
 0x489   : > { %2816 = vst [vmem:[%s5971_s4 + $0x70] sm:$0xff] %v2800_v39  ;;  %v2801_v7 = vmax.f32 %v2785_v59, 0.0 }
 0x48a   : > { %2814 = vst [vmem:[%s5971_s4 + $0x60] sm:$0xff] %v2798_v50  ;;  %v2799_v28 = vmax.f32 %v2783_v46, 0.0 }
 0x48b   : > { %2817 = vst [vmem:[%s5971_s4 + $0x78] sm:$0xff] %v2801_v7 }
 0x48c   : > { %2815 = vst [vmem:[%s5971_s4 + $0x68] sm:$0xff] %v2799_v28 }
 0x48d   : > { %4401 = shalt.err (!%p4398_p13)
}
 0x48e   : > { %s4402_s28 = scalar_lea.hbm %s6019_s27, 2048  ;;  %s4406_s29 = scalar_lea.hbm %s6340_s23, 8192 }
 0x48f   : > { %p4403_p11 = scmp.ne.s32.totalorder %s6019_s27, %s4402_s28  ;;  %p4407_p3 = scmp.lt.u32.totalorder %s6019_s27, %s6340_s23 }
 0x490   : > { %p4408_p12 = scmp.lt.u32.totalorder %s4406_s29, %s4402_s28  ;;  %p4410_p5 = scmp.lt.u32.totalorder %s4402_s28, %s6019_s27 }
 0x491   : > { %p4404_p0 = pnand %p4403_p11, %p6341_p10 }
 0x492   : > { %p4409_p4 = por %p4408_p12, %p4407_p3 }
 0x493   : > { %p4405_p1 = pneg %p4404_p0 }
 0x494   : > { %p4411_p8 = por %p4410_p5, %p4409_p4 }
 0x496   : > { %p4412_p2 = pnand %p4411_p8, %p4405_p1 }
 0x498   : > { %4415 = shalt.err (!%p4412_p2)
}
 0x499   : > { %s4566_s30 = smov 128   ;;  %s4567_s20 = smov 8  }
 0x49a   : > { %3952 = dma.vmem_to_hbm [thread:$0]  (%p6341_p10), %s6013_s1, 2048, %s6019_s27, %s2819_s9, %s4566_s30, %s4566_s30, %s4567_s20  }
 0x49b PF: > { %s6342_s21 = sld [smem:[#allocation35_spill]]  ;;  %p3985_p9 = scmp.ge.s32.totalorder %s4550_s22, 2 }
 0x49c   : > { %s2850_s13 = sand.u32 1, %s4522_s15  }
 0x49d   : > { %s2851_s19 = scalar_lea.sflag [#allocation4], %s2850_s13 }
 0x4a1   : > { %p6343_p7 = scmp.ne.s32.totalorder %s6342_s21, 0 }
 0x4a3   : > { %p3975_p6 = pnand %p3985_p9, %p6343_p7 }
 0x4a5   : > { %4493 = dma.done.wait (!%p3975_p6), %s2851_s19, 2048  }
 0x4a6   : > { %4495 = vsyncadd (!%p3975_p6), %s2851_s19, 4294965248  ;;  %s30_s22 = sadd.s32 1, %s4550_s22   ;;  %s6345_s30 = sld [smem:[#allocation21_spill]] }
 0x4a7   : > { %p6052_p13 = scmp.ge.s32.totalorder %s30_s22, 6   ;;  %s6346_s10 = sld [smem:[#allocation22_spill]] }
 0x4a8   : > { %s6347_s26 = sld [smem:[#allocation23_spill]]  ;;  %s6348_s6 = smov %s4780_s12 }
 0x4a9   : > { %s6349_s1 = sld [smem:[#allocation34_spill]]  ;;  %s6350_s18 = sld [smem:[#allocation26_spill]] }
 0x4aa   : > { %s6351_s19 = sld [smem:[#allocation27_spill]]  ;;  %s6352_s20 = sld [smem:[#allocation29_spill]] }
 0x4ab   : > { %s6353_s21 = sld [smem:[#allocation30_spill]]  ;;  %s6355_s13 = smov %s4518_s14 }
 0x4ac   : > { %s6356_s14 = smov %s6348_s6  ;;  %s6357_s15 = smov %s4526_s16 }
 0x4ad   : > { %s6358_s16 = smov %s4530_s17  ;;  %29 = sbr.rel (!%p6052_p13) target bundleno = 25 (0x19), region = 139 }
 0x4ae   : > { %s6354_s12 = smov %s6347_s26 }
 0x4af   : > { %s6359_s17 = smov %s6349_s1 }
 0x4b4   :  { %2856 = vsyncpa [#allocation3], 1 }
 0x4b5   :  { %2858 = vsyncpa [#allocation3 + $0x1], 1 }
 0x4b6   :  { %2859 = vsyncpa [#allocation6], 1 }
 0x4b7   :  { %2861 = vsyncpa [#allocation6 + $0x1], 1 }
 0x4b8   :  { %2862 = vsyncpa [#allocation9], 1 }
 0x4b9   :  { %2863 = vsyncpa [#allocation12], 1 }
 0x4ba   :  { %2864 = vsyncpa [#allocation4], 1 }
 0x4bb   :  { %2866 = vsyncpa [#allocation4 + $0x1], 1 }

</bundles_post_ra>
